<compile_context>
chip_gen: v7x
topology: tpu7x:2x2x1
jax: 0.10.0
libtpu: 0.0.40
codegen_flags: <defaults>
</compile_context>

<pallas_src>
import jax
import jax.numpy as jnp
from jax import lax
from jax.experimental import pallas as pl
from jax.experimental.pallas import tpu as pltpu


# ----------------------------------------------------------------------------
# 3x3 conv (stride 1, pad 1) + bias + ReLU, im2col fused into the kernel.
# Output layout: (N, H*W, Cout)  -- row-major NHWC-equivalent, kept downstream.
# ----------------------------------------------------------------------------
def conv3x3_relu_rows(x_nchw, weight_oihw, bias):
    n, cin, h, w = x_nchw.shape
    cout = weight_oihw.shape[0]
    kdim = 9 * cin  # 27 real contraction elements (Mosaic pads internally)

    # --- minimal wrapper glue: NCHW -> zero-padded NHWC (one transpose + one pad)
    x_pad = jnp.pad(
        jnp.transpose(x_nchw, (0, 2, 3, 1)),          # (N, H, W, Cin)
        ((0, 0), (1, 1), (1, 1), (0, 0)),
    )                                                  # (N, H+2, W+2, Cin)

    # weights in (kh, kw, ci) tap order, matching the in-kernel im2col order
    w_mat = jnp.transpose(weight_oihw, (2, 3, 1, 0)).reshape(kdim, cout)  # (27, Cout)
    b_row = bias.reshape(1, cout)

    def kernel(x_ref, w_ref, b_ref, o_ref):
        # x_ref: (H+2, W+2, Cin)   padded slab for the current batch element
        # w_ref: (27, Cout)        resident across the whole grid
        # b_ref: (1, Cout)
        # o_ref: (H*W, Cout)
        # Build the im2col patch tile entirely in VMEM: 9 static shifted views,
        # concatenated along the channel (lane) axis, leading dims collapsed.
        taps = [x_ref[kh:kh + h, kw:kw + w, :]
                for kh in range(3) for kw in range(3)]         # 9 x (H, W, Cin)
        patches = jnp.concatenate(taps, axis=-1)               # (H, W, 9*Cin)
        patches = patches.reshape(h * w, kdim)                 # (H*W, 27)
        # Single MXU push, f32 accumulation.
        # NOTE: cast patches/w to bf16 here (keep preferred f32) once shapes grow;
        # at this size the kernel is launch/DMA bound and f32 keeps parity tight.
        acc = jnp.dot(patches, w_ref[...], preferred_element_type=jnp.float32)
        acc = acc + b_ref[...]
        # NOTE: Cout=64 < 128 lanes => masked stores; pad Cout to 128 (or present a
        # (H, W*Cout) slab) only if this ever becomes store-bound at large N*H*W.
        o_ref[...] = jnp.maximum(acc, 0.0).astype(o_ref.dtype)

    # Grid over batch: independent output blocks -> "parallel" (megacore on v7x).
    # TODO(synk): for large N*H*W, switch to a row-tiled grid (block rows 1024-4096,
    # multiple of 8) so the per-block VMEM footprint stays bounded on v7x (64 MiB).
    out = pl.pallas_call(
        kernel,
        out_shape=jax.ShapeDtypeStruct((n, h * w, cout), x_nchw.dtype),
        grid_spec=pltpu.PrefetchScalarGridSpec(
            num_scalar_prefetch=0,
            grid=(n,),
            in_specs=[
                pl.BlockSpec((pl.Squeezed(), h + 2, w + 2, cin),
                             lambda b: (b, 0, 0, 0)),
                pl.BlockSpec((kdim, cout), lambda b: (0, 0)),
                pl.BlockSpec((1, cout), lambda b: (0, 0)),
            ],
            out_specs=pl.BlockSpec((pl.Squeezed(), h * w, cout),
                                   lambda b: (b, 0, 0)),
        ),
        compiler_params=pltpu.CompilerParams(
            dimension_semantics=("parallel",)),
    )(x_pad, w_mat, b_row)
    return out  # (N, H*W, Cout)


# ----------------------------------------------------------------------------
# Model forward
# ----------------------------------------------------------------------------
def model_forward(v1, params):
    # cat(split(v1, [1,1,1], dim=1), dim=1) is exactly v1: no copy, no kernel.
    concatenated_tensor = v1

    # v2 = relu1(conv1(v1)) -- the only real compute in the module. Its result
    # is not part of the original return value; kept (lane-dense rows) for
    # completeness / verification.
    v2_rows = conv3x3_relu_rows(v1, params["conv1_w"], params["conv1_b"])

    # TODO(synk): conv2/relu2 expect 64 input channels but are applied to the
    # 3-channel tensor in the original module (would raise in PyTorch); v4 is
    # unreachable/unused, so it is intentionally not computed here.

    splits = (v1[:, 0:1], v1[:, 1:2], v1[:, 2:3])
    return (concatenated_tensor, splits), v2_rows


def init_params(key):
    k1, k2 = jax.random.split(key)
    # Conv2d(3, 64, 3, 1, 1)
    conv1_w = 0.05 * jax.random.normal(k1, (64, 3, 3, 3), jnp.float32)
    conv1_b = 0.01 * jnp.arange(64, dtype=jnp.float32)
    # Conv2d(64, 64, 3, 1, 1) -- defined for parity with __init__, unused
    conv2_w = 0.05 * jax.random.normal(k2, (64, 64, 3, 3), jnp.float32)
    conv2_b = jnp.zeros((64,), jnp.float32)
    return {"conv1_w": conv1_w, "conv1_b": conv1_b,
            "conv2_w": conv2_w, "conv2_b": conv2_b}


if __name__ == "__main__":
    key = jax.random.PRNGKey(0)
    kx, kp = jax.random.split(key)

    # shapes consistent with the module: C=3 required by split [1,1,1]
    N, C, H, W = 2, 3, 16, 16
    v1 = jax.random.normal(kx, (N, C, H, W), jnp.float32)
    params = init_params(kp)

    (concat_out, splits), v2_rows = model_forward(v1, params)
    jax.block_until_ready(v2_rows)
    jax.block_until_ready(concat_out)
    for s in splits:
        jax.block_until_ready(s)

    # --- correctness checks (harness only; relayout to NCHW happens here) ---
    assert jnp.array_equal(concat_out, v1), "identity (cat of splits) mismatch"
    assert all(jnp.allclose(s, v1[:, i:i + 1]) for i, s in enumerate(splits))

    v2_nchw = jnp.transpose(v2_rows.reshape(N, H, W, -1), (0, 3, 1, 2))
    ref_conv = lax.conv_general_dilated(
        v1, params["conv1_w"], window_strides=(1, 1), padding=((1, 1), (1, 1)),
        dimension_numbers=("NCHW", "OIHW", "NCHW"))
    ref_v2 = jnp.maximum(ref_conv + params["conv1_b"][None, :, None, None], 0.0)
    assert jnp.allclose(v2_nchw, ref_v2, atol=1e-4, rtol=1e-4), "conv1+relu mismatch"

    print("KERNEL_OK")
</pallas_src>

<mosaic_0001>
module attributes {stable_mosaic.version = 11 : i64} {
  func.func @kernel(%arg0: i32, %arg1: memref<1x18x18x3xf32, #tpu.memory_space<vmem>>, %arg2: memref<27x64xf32, #tpu.memory_space<vmem>>, %arg3: memref<1x64xf32, #tpu.memory_space<vmem>>, %arg4: memref<1x256x64xf32, #tpu.memory_space<vmem>>) attributes {dimension_semantics = [#tpu.dimension_semantics<parallel>], iteration_bounds = array<i64: 2>, scalar_prefetch = 0 : i64, scratch_operands = 0 : i64, tpu.core_type = #tpu.core_type<tc>, window_params = [{transform_indices = @transform_0, window_bounds = array<i64: 1, 18, 18, 3>}, {pipeline_mode = #tpu.pipeline_mode<synchronous>, transform_indices = @transform_1, window_bounds = array<i64: 27, 64>}, {pipeline_mode = #tpu.pipeline_mode<synchronous>, transform_indices = @transform_2, window_bounds = array<i64: 1, 64>}, {transform_indices = @transform_3, window_bounds = array<i64: 1, 256, 64>}]} {
    %c0 = arith.constant 0 : index
    %c0_0 = arith.constant 0 : index
    %c0_1 = arith.constant 0 : index
    %c0_2 = arith.constant 0 : index
    %0 = vector.load %arg1[%c0, %c0_0, %c0_1, %c0_2] : memref<1x18x18x3xf32, #tpu.memory_space<vmem>>, vector<1x16x16x3xf32>
    %1 = vector.shape_cast %0 : vector<1x16x16x3xf32> to vector<16x16x3xf32>
    %c0_3 = arith.constant 0 : index
    %c0_4 = arith.constant 0 : index
    %c1 = arith.constant 1 : index
    %c0_5 = arith.constant 0 : index
    %2 = vector.load %arg1[%c0_3, %c0_4, %c1, %c0_5] : memref<1x18x18x3xf32, #tpu.memory_space<vmem>>, vector<1x16x16x3xf32>
    %3 = vector.shape_cast %2 : vector<1x16x16x3xf32> to vector<16x16x3xf32>
    %c0_6 = arith.constant 0 : index
    %c0_7 = arith.constant 0 : index
    %c2 = arith.constant 2 : index
    %c0_8 = arith.constant 0 : index
    %4 = vector.load %arg1[%c0_6, %c0_7, %c2, %c0_8] : memref<1x18x18x3xf32, #tpu.memory_space<vmem>>, vector<1x16x16x3xf32>
    %5 = vector.shape_cast %4 : vector<1x16x16x3xf32> to vector<16x16x3xf32>
    %c0_9 = arith.constant 0 : index
    %c1_10 = arith.constant 1 : index
    %c0_11 = arith.constant 0 : index
    %c0_12 = arith.constant 0 : index
    %6 = vector.load %arg1[%c0_9, %c1_10, %c0_11, %c0_12] : memref<1x18x18x3xf32, #tpu.memory_space<vmem>>, vector<1x16x16x3xf32>
    %7 = vector.shape_cast %6 : vector<1x16x16x3xf32> to vector<16x16x3xf32>
    %c0_13 = arith.constant 0 : index
    %c1_14 = arith.constant 1 : index
    %c1_15 = arith.constant 1 : index
    %c0_16 = arith.constant 0 : index
    %8 = vector.load %arg1[%c0_13, %c1_14, %c1_15, %c0_16] : memref<1x18x18x3xf32, #tpu.memory_space<vmem>>, vector<1x16x16x3xf32>
    %9 = vector.shape_cast %8 : vector<1x16x16x3xf32> to vector<16x16x3xf32>
    %c0_17 = arith.constant 0 : index
    %c1_18 = arith.constant 1 : index
    %c2_19 = arith.constant 2 : index
    %c0_20 = arith.constant 0 : index
    %10 = vector.load %arg1[%c0_17, %c1_18, %c2_19, %c0_20] : memref<1x18x18x3xf32, #tpu.memory_space<vmem>>, vector<1x16x16x3xf32>
    %11 = vector.shape_cast %10 : vector<1x16x16x3xf32> to vector<16x16x3xf32>
    %c0_21 = arith.constant 0 : index
    %c2_22 = arith.constant 2 : index
    %c0_23 = arith.constant 0 : index
    %c0_24 = arith.constant 0 : index
    %12 = vector.load %arg1[%c0_21, %c2_22, %c0_23, %c0_24] : memref<1x18x18x3xf32, #tpu.memory_space<vmem>>, vector<1x16x16x3xf32>
    %13 = vector.shape_cast %12 : vector<1x16x16x3xf32> to vector<16x16x3xf32>
    %c0_25 = arith.constant 0 : index
    %c2_26 = arith.constant 2 : index
    %c1_27 = arith.constant 1 : index
    %c0_28 = arith.constant 0 : index
    %14 = vector.load %arg1[%c0_25, %c2_26, %c1_27, %c0_28] : memref<1x18x18x3xf32, #tpu.memory_space<vmem>>, vector<1x16x16x3xf32>
    %15 = vector.shape_cast %14 : vector<1x16x16x3xf32> to vector<16x16x3xf32>
    %c0_29 = arith.constant 0 : index
    %c2_30 = arith.constant 2 : index
    %c2_31 = arith.constant 2 : index
    %c0_32 = arith.constant 0 : index
    %16 = vector.load %arg1[%c0_29, %c2_30, %c2_31, %c0_32] : memref<1x18x18x3xf32, #tpu.memory_space<vmem>>, vector<1x16x16x3xf32>
    %17 = vector.shape_cast %16 : vector<1x16x16x3xf32> to vector<16x16x3xf32>
    %18 = tpu.concatenate %1, %3, %5, %7, %9, %11, %13, %15, %17 in 2 : vector<16x16x3xf32>, vector<16x16x3xf32>, vector<16x16x3xf32>, vector<16x16x3xf32>, vector<16x16x3xf32>, vector<16x16x3xf32>, vector<16x16x3xf32>, vector<16x16x3xf32>, vector<16x16x3xf32> -> vector<16x16x27xf32>
    %19 = vector.shape_cast %18 : vector<16x16x27xf32> to vector<256x27xf32>
    %c0_33 = arith.constant 0 : index
    %c0_34 = arith.constant 0 : index
    %20 = vector.load %arg2[%c0_33, %c0_34] : memref<27x64xf32, #tpu.memory_space<vmem>>, vector<27x64xf32>
    %cst = arith.constant dense<0.000000e+00> : vector<256x64xf32>
    %21 = tpu.matmul %19, %20, %cst {dimension_numbers = #tpu.dot_dimension_numbers<[1], [0], [0], [1], [0, 0, 1, 1], [], []>} : vector<256x27xf32>, vector<27x64xf32>, vector<256x64xf32> -> vector<256x64xf32>
    %c0_35 = arith.constant 0 : index
    %c0_36 = arith.constant 0 : index
    %22 = vector.load %arg3[%c0_35, %c0_36] : memref<1x64xf32, #tpu.memory_space<vmem>>, vector<1x64xf32>
    %23 = vector.broadcast %22 : vector<1x64xf32> to vector<256x64xf32>
    %24 = arith.addf %21, %23 : vector<256x64xf32>
    %cst_37 = arith.constant 0.000000e+00 : f32
    %25 = vector.broadcast %cst_37 : f32 to vector<256x64xf32>
    %26 = arith.maximumf %24, %25 : vector<256x64xf32>
    %c0_38 = arith.constant 0 : index
    %c0_39 = arith.constant 0 : index
    %c0_40 = arith.constant 0 : index
    %27 = vector.load %arg4[%c0_38, %c0_39, %c0_40] : memref<1x256x64xf32, #tpu.memory_space<vmem>>, vector<1x256x64xf32>
    %28 = vector.shape_cast %27 : vector<1x256x64xf32> to vector<256x64xf32>
    %29 = vector.shape_cast %26 : vector<256x64xf32> to vector<1x256x64xf32>
    tpu.vector_store %arg4[%c0_38, %c0_39, %c0_40], %29 {strides = array<i32>} : memref<1x256x64xf32, #tpu.memory_space<vmem>>, vector<1x256x64xf32>,
    return
  }
  func.func @transform_0(%arg0: i32) -> (i32, i32, i32, i32) {
    %c0_i32 = arith.constant 0 : i32
    %c0_i32_0 = arith.constant 0 : i32
    %c0_i32_1 = arith.constant 0 : i32
    %c0_i32_2 = arith.constant 0 : i32
    return %arg0, %c0_i32, %c0_i32_0, %c0_i32_1 : i32, i32, i32, i32
  }
  func.func @transform_1(%arg0: i32) -> (i32, i32) {
    %c0_i32 = arith.constant 0 : i32
    %c0_i32_0 = arith.constant 0 : i32
    %c0_i32_1 = arith.constant 0 : i32
    return %c0_i32, %c0_i32_0 : i32, i32
  }
  func.func @transform_2(%arg0: i32) -> (i32, i32) {
    %c0_i32 = arith.constant 0 : i32
    %c0_i32_0 = arith.constant 0 : i32
    %c0_i32_1 = arith.constant 0 : i32
    return %c0_i32, %c0_i32_0 : i32, i32
  }
  func.func @transform_3(%arg0: i32) -> (i32, i32, i32) {
    %c0_i32 = arith.constant 0 : i32
    %c0_i32_0 = arith.constant 0 : i32
    %c0_i32_1 = arith.constant 0 : i32
    return %arg0, %c0_i32, %c0_i32_0 : i32, i32, i32
  }
}

</mosaic_0001>

<bundles_post_ra>
// kernel: tpu_custom_call.1
= control target key start
LH: loop header
LB: loop body
LE: loop exit
PB: predicated region body
PF: predicated region fallthrough
CT: control target
= control target key end

     0   :  { %s2604_s12 = smov 0   ;;  %s4096_s0 = inlined_call_operand.vmem [shape: f32[2,18,18,3], index: 0, kind: input, shape index: {}]   ;;  %s4097_s1 = inlined_call_operand.vmem [shape: f32[27,64], index: 1, kind: input, shape index: {}]   ;;  %s4098_s2 = inlined_call_operand.vmem [shape: f32[1,64], index: 2, kind: input, shape index: {}]   ;;  %s4099_s3 = inlined_call_operand.vmem [shape: f32[2,256,64], index: 3, kind: output, shape index: {}]  }
   0x1 LB: > { %s2206_s13 = sadd.s32 4294967295, %s2573_s12   ;;  %p2210_p0 = scmp.ge.s32.totalorder %s2573_s12, 1  ;;  %s2573_s12 = sphi %s2604_s12, %s13_s12  }
   0x2   : > { %p137_p1 = scmp.lt.s32.totalorder %s2573_s12, 3 }
   0x4   : > { %p138_p2 = pnand %p2210_p0, %p137_p1 }
   0x6   : > { %141 = sbr.rel (%p138_p2) target bundleno = 862 (0x35e), region = 32 }
   0xd   : > { %p161_p3 = scmp.lt.s32.totalorder %s2206_s13, 1  ;;  %s2575_s18 = smov 3   ;;  %vm1485_vm0 = vcmask 23552   ;;  %vm1518_vm1 = vcmask 48128   ;;  %vm1857_vm2 = vcmask 1042432   ;;  %vm2582_vm3 = vmmov 1  }
   0xe   : > { %s2576_s19 = smov 6   ;;  %s2577_s20 = smov 9   ;;  %vm2540_vm4 = vmpackc.low %vm1857_vm2, %vm2582_vm3  ;;  %vm1551_vm5 = vcmask 72704   ;;  %vm1584_vm6 = vcmask 97280   ;;  %vm1617_vm7 = vcmask 121856   ;;  %vm1650_vm8 = vcmask 146432  }
   0xf   : > { %s4239_s13 = smov (!%p161_p3, %s2206_s13), 1  ;;  %s2578_s21 = smov 12   ;;  %vm1683_vm9 = vcmask 171008   ;;  %vm1716_vm10 = vcmask 195584   ;;  %vm1760_vm11 = vcmask 220160   ;;  %vm2118_vm12 = vcmask 523264  }
  0x10   : > { %s2549_s14 = smul.u32 432, %s4239_s13  ;;  %s2579_s22 = smov 15  }
  0x11   : > { %s2580_s23 = smov 18   ;;  %s2581_s28 = smov 21  }
  0x12   : > { %s2618_s17 = scalar_lea.vmem %s4096_s0, %s2549_s14  ;;  %s2583_s6 = smov 24  }
  0x13   : > { %v2621_v0 = vld [vmem:[%s2618_s17 + $0x19] sm:$0xff]  ;;  %v203_v1 = vld [vmem:[%s2618_s17 + $0x1] sm:$0xff]  ;;  %v204_v3 = vld [vmem:[%s2618_s17 + $0x9] sm:$0xff]  ;;  %s2442_s9 = sshll.u32 %s4239_s13, 8 }
  0x14   : > { %497 = vrot.lane.b32.xlu1 %v2621_v0, %s2575_s18  ;;  %493 = vrot.lane.b32.xlu0 %v203_v1, %s2575_s18  ;;  %v2628_v2 = vld [vmem:[%s2618_s17 + $0x21] sm:$0xff]  ;;  %v2635_v4 = vld [vmem:[%s2618_s17 + $0x39] sm:$0xff]  ;;  %s3931_s14 = scalar_lea.vmem %s4099_s3, %s2442_s9 }
  0x15   : > { %v2638_v5 = vld [vmem:[%s2618_s17 + $0x31] sm:$0xff]  ;;  %v2648_v7 = vld [vmem:[%s2618_s17 + $0x49] sm:$0xff]  ;;  %v2656_v9 = vld [vmem:[%s2618_s17 + $0x61] sm:$0xff] }
  0x16   : > { %v2645_v6 = vld [vmem:[%s2618_s17 + $0x51] sm:$0xff]  ;;  %v212_v8 = vld [vmem:[%s2618_s17 + $0x69] sm:$0xff]  ;;  %4142 = vst [vmem:[#allocation2_spill] sm:$0xff] %v2656_v9  ;;  %v214_v10 = vld [vmem:[%s2618_s17 + $0x81] sm:$0xff] }
  0x17   : > { %v213_v11 = vld [vmem:[%s2618_s17 + $0x79] sm:$0xff]  ;;  %v215_v13 = vld [vmem:[%s2618_s17 + $0x91] sm:$0xff]  ;;  %v217_v15 = vld [vmem:[%s2618_s17 + $0xa9] sm:$0xff] }
  0x18   : > { %499 = vrot.lane.b32.xlu1 %v2628_v2, %s2575_s18  ;;  %495 = vrot.lane.b32.xlu0 %v204_v3, %s2575_s18  ;;  %v216_v12 = vld [vmem:[%s2618_s17 + $0x99] sm:$0xff]  ;;  %v218_v14 = vld [vmem:[%s2618_s17 + $0xb1] sm:$0xff] }
  0x19   : > { %v220_v16 = vld [vmem:[%s2618_s17 + $0xc9] sm:$0xff]  ;;  %v219_v17 = vld [vmem:[%s2618_s17 + $0xc1] sm:$0xff]  ;;  %v2681_v19 = vld [vmem:[%s2618_s17 + $0xd9] sm:$0xff] }
  0x1a   : > { %v2678_v18 = vld [vmem:[%s2618_s17 + $0xe1] sm:$0xff]  ;;  %v2688_v20 = vld [vmem:[%s2618_s17 + $0xf9] sm:$0xff]  ;;  %v2691_v21 = vld [vmem:[%s2618_s17 + $0xf1] sm:$0xff] }
  0x1b   : > { %v2698_v22 = vld [vmem:[%s2618_s17 + $0x111] sm:$0xff]  ;;  %v2701_v23 = vld [vmem:[%s2618_s17 + $0x109] sm:$0xff]  ;;  %v2711_v25 = vld [vmem:[%s2618_s17 + $0x121] sm:$0xff] }
  0x1c   : > { %503 = vrot.lane.b32.xlu1 %v2635_v4, %s2575_s18  ;;  %501 = vrot.lane.b32.xlu0 %v2638_v5, %s2575_s18  ;;  %4143 = vst [vmem:[#allocation3_spill] sm:$0xff] %v2698_v22  ;;  %4144 = vst [vmem:[#allocation4_spill] sm:$0xff] %v2701_v23  ;;  %v2708_v24 = vld [vmem:[%s2618_s17 + $0x129] sm:$0xff]  ;;  %v230_v26 = vld [vmem:[%s2618_s17 + $0x141] sm:$0xff] }
  0x1d   : > { %4145 = vst [vmem:[#allocation5_spill] sm:$0xff] %v2708_v24  ;;  %4146 = vst [vmem:[#allocation6_spill] sm:$0xff] %v2711_v25  ;;  %v229_v27 = vld [vmem:[%s2618_s17 + $0x139] sm:$0xff]  ;;  %v231_v29 = vld [vmem:[%s2618_s17 + $0x151] sm:$0xff] }
  0x1e   : > { %v232_v28 = vld [vmem:[%s2618_s17 + $0x159] sm:$0xff]  ;;  %v234_v30 = vld [vmem:[%s2618_s17 + $0x171] sm:$0xff]  ;;  %v233_v31 = vld [vmem:[%s2618_s17 + $0x169] sm:$0xff] }
  0x1f   : > { %v236_v32 = vld [vmem:[%s2618_s17 + $0xa] sm:$0xff]  ;;  %v235_v33 = vld [vmem:[%s2618_s17 + $0x2] sm:$0xff]  ;;  %v2737_v35 = vld [vmem:[%s2618_s17 + $0x1a] sm:$0xff] }
  0x20   : > { %507 = vrot.lane.b32.xlu1 %v2645_v6, %s2575_s18  ;;  %505 = vrot.lane.b32.xlu0 %v2648_v7, %s2575_s18  ;;  %v2734_v34 = vld [vmem:[%s2618_s17 + $0x22] sm:$0xff]  ;;  %v2744_v36 = vld [vmem:[%s2618_s17 + $0x3a] sm:$0xff] }
  0x21   : > { %4147 = vst [vmem:[#allocation7_spill] sm:$0xff] %v2744_v36  ;;  %v2747_v37 = vld [vmem:[%s2618_s17 + $0x32] sm:$0xff]  ;;  %v2757_v39 = vld [vmem:[%s2618_s17 + $0x4a] sm:$0xff]  ;;  %v2767_v41 = vld [vmem:[%s2618_s17 + $0x62] sm:$0xff] }
  0x22   : > { %v2754_v38 = vld [vmem:[%s2618_s17 + $0x52] sm:$0xff]  ;;  %4149 = vst [vmem:[#allocation9_spill] sm:$0xff] %v2757_v39  ;;  %v2764_v40 = vld [vmem:[%s2618_s17 + $0x6a] sm:$0xff]  ;;  %4151 = vst [vmem:[#allocation11_spill] sm:$0xff] %v2767_v41 }
  0x23   : > { %4148 = vst [vmem:[#allocation8_spill] sm:$0xff] %v2754_v38  ;;  %4150 = vst [vmem:[#allocation10_spill] sm:$0xff] %v2764_v40  ;;  %v246_v42 = vld [vmem:[%s2618_s17 + $0x82] sm:$0xff]  ;;  %v245_v43 = vld [vmem:[%s2618_s17 + $0x7a] sm:$0xff] }
  0x24   : > { %511 = vrot.lane.b32.xlu1 %v212_v8, %s2575_s18  ;;  %509 = vrot.lane.b32.xlu0 %v2656_v9, %s2575_s18  ;;  %v248_v44 = vld [vmem:[%s2618_s17 + $0x9a] sm:$0xff]  ;;  %v247_v45 = vld [vmem:[%s2618_s17 + $0x92] sm:$0xff] }
  0x25   : > { %v250_v46 = vld [vmem:[%s2618_s17 + $0xb2] sm:$0xff]  ;;  %v249_v47 = vld [vmem:[%s2618_s17 + $0xaa] sm:$0xff]  ;;  %v251_v49 = vld [vmem:[%s2618_s17 + $0xc2] sm:$0xff] }
  0x26   : > { %v252_v48 = vld [vmem:[%s2618_s17 + $0xca] sm:$0xff]  ;;  %v2790_v50 = vld [vmem:[%s2618_s17 + $0xe2] sm:$0xff]  ;;  %v2793_v51 = vld [vmem:[%s2618_s17 + $0xda] sm:$0xff] }
  0x27   : > { %v2800_v52 = vld [vmem:[%s2618_s17 + $0xfa] sm:$0xff]  ;;  %v2803_v53 = vld [vmem:[%s2618_s17 + $0xf2] sm:$0xff]  ;;  %v2813_v55 = vld [vmem:[%s2618_s17 + $0x10a] sm:$0xff] }
  0x28   : > { %515 = vrot.lane.b32.xlu1 %v214_v10, %s2575_s18  ;;  %513 = vrot.lane.b32.xlu0 %v213_v11, %s2575_s18  ;;  %4152 = vst [vmem:[#allocation12_spill] sm:$0xff] %v2800_v52  ;;  %4153 = vst [vmem:[#allocation13_spill] sm:$0xff] %v2803_v53  ;;  %v2810_v54 = vld [vmem:[%s2618_s17 + $0x112] sm:$0xff]  ;;  %v2820_v56 = vld [vmem:[%s2618_s17 + $0x12a] sm:$0xff] }
  0x29   : > { %4154 = vst [vmem:[#allocation14_spill] sm:$0xff] %v2810_v54  ;;  %4155 = vst [vmem:[#allocation15_spill] sm:$0xff] %v2813_v55  ;;  %v2823_v57 = vld [vmem:[%s2618_s17 + $0x122] sm:$0xff]  ;;  %v2831_v59 = vld [vmem:[%s2618_s17 + $0x13a] sm:$0xff] }
  0x2a   : > { %4156 = vst [vmem:[#allocation16_spill] sm:$0xff] %v2820_v56  ;;  %4157 = vst [vmem:[#allocation17_spill] sm:$0xff] %v2823_v57  ;;  %v262_v58 = vld [vmem:[%s2618_s17 + $0x142] sm:$0xff]  ;;  %v264_v62 = vld [vmem:[%s2618_s17 + $0x15a] sm:$0xff] }
  0x2b   : > { %4158 = vst [vmem:[#allocation18_spill] sm:$0xff] %v2831_v59  ;;  %v263_v63 = vld [vmem:[%s2618_s17 + $0x152] sm:$0xff]  ;;  %v265_v10 = vld [vmem:[%s2618_s17 + $0x16a] sm:$0xff] }
  0x2c   : > { %519 = vrot.lane.b32.xlu1 %v216_v12, %s2575_s18  ;;  %517 = vrot.lane.b32.xlu0 %v215_v13, %s2575_s18  ;;  %v266_v8 = vld [vmem:[%s2618_s17 + $0x172] sm:$0xff] }
  0x30   : > { %523 = vrot.lane.b32.xlu1 %v218_v14, %s2575_s18  ;;  %521 = vrot.lane.b32.xlu0 %v217_v15, %s2575_s18  ;;  %v2861_v15 = vld [vmem:[%s2618_s17 + $0x18] sm:$0xff] }
  0x31   : > { %4163 = vst [vmem:[#allocation23_spill] sm:$0xff] %v2861_v15 }
  0x34   : > { %527 = vrot.lane.b32.xlu1 %v220_v16, %s2575_s18  ;;  %525 = vrot.lane.b32.xlu0 %v219_v17, %s2575_s18  ;;  %v2864_v16 = vld [vmem:[%s2618_s17 + $0x20] sm:$0xff] }
  0x35   : > { %4164 = vst [vmem:[#allocation24_spill] sm:$0xff] %v2864_v16 }
  0x38   : > { %531 = vrot.lane.b32.xlu1 %v2678_v18, %s2575_s18  ;;  %529 = vrot.lane.b32.xlu0 %v2681_v19, %s2575_s18 }
  0x3c   : > { %535 = vrot.lane.b32.xlu1 %v2688_v20, %s2575_s18  ;;  %533 = vrot.lane.b32.xlu0 %v2691_v21, %s2575_s18 }
  0x40   : > { %539 = vrot.lane.b32.xlu1 %v2698_v22, %s2575_s18  ;;  %537 = vrot.lane.b32.xlu0 %v2701_v23, %s2575_s18  ;;  %v3041_v23 = vld [vmem:[%s2618_s17 + $0x158] sm:$0xff] }
  0x44   : > { %543 = vrot.lane.b32.xlu1 %v2708_v24, %s2575_s18  ;;  %541 = vrot.lane.b32.xlu0 %v2711_v25, %s2575_s18  ;;  %v202_v24 = vld [vmem:[%s2618_s17 + $0x170] sm:$0xff] }
  0x48   : > { %547 = vrot.lane.b32.xlu1 %v230_v26, %s2575_s18  ;;  %545 = vrot.lane.b32.xlu0 %v229_v27, %s2575_s18  ;;  %v2875_v27 = vld [vmem:[%s2618_s17 + $0x38] sm:$0xff] }
  0x4c   : > { %551 = vrot.lane.b32.xlu1 %v232_v28, %s2575_s18  ;;  %549 = vrot.lane.b32.xlu0 %v231_v29, %s2575_s18  ;;  %v2878_v28 = vld [vmem:[%s2618_s17 + $0x30] sm:$0xff] }
  0x50   : > { %555 = vrot.lane.b32.xlu1 %v234_v30, %s2575_s18  ;;  %553 = vrot.lane.b32.xlu0 %v233_v31, %s2575_s18  ;;  %v2889_v31 = vld [vmem:[%s2618_s17 + $0x50] sm:$0xff] }
  0x54   : > { %623 = vrot.lane.b32.xlu1 %v236_v32, %s2576_s19  ;;  %621 = vrot.lane.b32.xlu0 %v235_v33, %s2576_s19  ;;  %v2892_v32 = vld [vmem:[%s2618_s17 + $0x48] sm:$0xff]  ;;  %v184_v33 = vld [vmem:[%s2618_s17 + $0x98] sm:$0xff] }
  0x58   : > { %627 = vrot.lane.b32.xlu1 %v2734_v34, %s2576_s19  ;;  %625 = vrot.lane.b32.xlu0 %v2737_v35, %s2576_s19 }
  0x5c   : > { %631 = vrot.lane.b32.xlu1 %v2744_v36, %s2576_s19  ;;  %629 = vrot.lane.b32.xlu0 %v2747_v37, %s2576_s19  ;;  %v3044_v36 = vld [vmem:[%s2618_s17 + $0x150] sm:$0xff] }
  0x5d   : > { %4178 = vst [vmem:[#allocation38_spill] sm:$0xff] %v3044_v36 }
  0x60   : > { %635 = vrot.lane.b32.xlu1 %v2754_v38, %s2576_s19  ;;  %633 = vrot.lane.b32.xlu0 %v2757_v39, %s2576_s19  ;;  %v3024_v38 = vld [vmem:[%s2618_s17 + $0x140] sm:$0xff] }
  0x64   : > { %639 = vrot.lane.b32.xlu1 %v2764_v40, %s2576_s19  ;;  %637 = vrot.lane.b32.xlu0 %v2767_v41, %s2576_s19  ;;  %v3011_v41 = vld [vmem:[%s2618_s17 + $0x128] sm:$0xff] }
  0x68   : > { %643 = vrot.lane.b32.xlu1 %v246_v42, %s2576_s19  ;;  %641 = vrot.lane.b32.xlu0 %v245_v43, %s2576_s19 }
  0x6c   : > { %647 = vrot.lane.b32.xlu1 %v248_v44, %s2576_s19  ;;  %645 = vrot.lane.b32.xlu0 %v247_v45, %s2576_s19  ;;  %v2902_v44 = vld [vmem:[%s2618_s17 + $0x68] sm:$0xff]  ;;  %v2905_v45 = vld [vmem:[%s2618_s17 + $0x60] sm:$0xff] }
  0x70   : > { %651 = vrot.lane.b32.xlu1 %v250_v46, %s2576_s19  ;;  %649 = vrot.lane.b32.xlu0 %v249_v47, %s2576_s19  ;;  %v186_v47 = vld [vmem:[%s2618_s17 + $0xb0] sm:$0xff] }
  0x74   : > { %655 = vrot.lane.b32.xlu1 %v252_v48, %s2576_s19  ;;  %653 = vrot.lane.b32.xlu0 %v251_v49, %s2576_s19  ;;  %v185_v48 = vld [vmem:[%s2618_s17 + $0xa8] sm:$0xff] }
  0x78   : > { %659 = vrot.lane.b32.xlu1 %v2790_v50, %s2576_s19  ;;  %657 = vrot.lane.b32.xlu0 %v2793_v51, %s2576_s19 }
  0x7c   : > { %663 = vrot.lane.b32.xlu1 %v2800_v52, %s2576_s19  ;;  %661 = vrot.lane.b32.xlu0 %v2803_v53, %s2576_s19 }
  0x80   : > { %667 = vrot.lane.b32.xlu1 %v2810_v54, %s2576_s19  ;;  %665 = vrot.lane.b32.xlu0 %v2813_v55, %s2576_s19  ;;  %v3027_v54 = vld [vmem:[%s2618_s17 + $0x138] sm:$0xff] }
  0x84   : > { %671 = vrot.lane.b32.xlu1 %v2820_v56, %s2576_s19  ;;  %669 = vrot.lane.b32.xlu0 %v2823_v57, %s2576_s19  ;;  %v3014_v57 = vld [vmem:[%s2618_s17 + $0x120] sm:$0xff] }
  0x86   : > { %v2833_v60 = vpop.permute.xlu1 %497  ;;  %v2835_v61 = vpop.permute.xlu0 %493 }
  0x87   : > { %4159 = vst [vmem:[#allocation19_spill] sm:$0xff] %v2833_v60  ;;  %4160 = vst [vmem:[#allocation20_spill] sm:$0xff] %v2835_v61  ;;  %v3000_v61 = vld [vmem:[%s2618_s17 + $0x108] sm:$0xff] }
  0x88   : > { %675 = vrot.lane.b32.xlu1 %v262_v58, %s2576_s19  ;;  %673 = vrot.lane.b32.xlu0 %v2831_v59, %s2576_s19 }
  0x8a   : > { %v2842_v1 = vpop.permute.xlu1 %499  ;;  %v2844_v3 = vpop.permute.xlu0 %495 }
  0x8b   : > { %4161 = vst [vmem:[#allocation21_spill] sm:$0xff] %v2842_v1  ;;  %4162 = vst [vmem:[#allocation22_spill] sm:$0xff] %v2844_v3  ;;  %v2937_v1 = vld [vmem:[%s2618_s17 + $0x90] sm:$0xff]  ;;  %v2957_v3 = vld [vmem:[%s2618_s17 + $0xc0] sm:$0xff] }
  0x8c   : > { %679 = vrot.lane.b32.xlu1 %v264_v62, %s2576_s19  ;;  %677 = vrot.lane.b32.xlu0 %v263_v63, %s2576_s19  ;;  %v2917_v62 = vld [vmem:[%s2618_s17 + $0x80] sm:$0xff]  ;;  %v2920_v63 = vld [vmem:[%s2618_s17 + $0x78] sm:$0xff]  ;;  %4170 = vst [vmem:[#allocation30_spill] sm:$0xff] %v2957_v3 }
  0x8e   : > { %v2850_v11 = vpop.permute.xlu1 %503  ;;  %v2852_v12 = vpop.permute.xlu0 %501 }
  0x8f   : > { %v1490_v53 = vsel %vm1485_vm0, %v2878_v28, %v2852_v12 }
  0x90   : > { %683 = vrot.lane.b32.xlu1 %v266_v8, %s2576_s19  ;;  %681 = vrot.lane.b32.xlu0 %v265_v10, %s2576_s19 }
  0x92   : > { %v2856_v13 = vpop.permute.xlu1 %507  ;;  %v2858_v14 = vpop.permute.xlu0 %505 }
  0x93   : > { %v1492_v12 = vsel %vm1485_vm0, %v2892_v32, %v2858_v14 }
  0x94   : > { %751 = vrot.lane.b32.xlu1 %v2864_v16, %s2577_s20  ;;  %749 = vrot.lane.b32.xlu0 %v2861_v15, %s2577_s20  ;;  %v2949_v15 = vld [vmem:[%s2618_s17 + $0xf0] sm:$0xff] }
  0x96   : > { %v2870_v17 = vpop.permute.xlu1 %511  ;;  %v2872_v26 = vpop.permute.xlu0 %509 }
  0x98   : > { %755 = vrot.lane.b32.xlu1 %v2875_v27, %s2577_s20  ;;  %753 = vrot.lane.b32.xlu0 %v2878_v28, %s2577_s20 }
  0x9a   : > { %v2884_v29 = vpop.permute.xlu1 %515  ;;  %v2886_v30 = vpop.permute.xlu0 %513 }
  0x9c   : > { %759 = vrot.lane.b32.xlu1 %v2889_v31, %s2577_s20  ;;  %757 = vrot.lane.b32.xlu0 %v2892_v32, %s2577_s20 }
  0x9e   : > { %v520_v42 = vpop.permute.xlu1 %519  ;;  %v2899_v43 = vpop.permute.xlu0 %517 }
  0x9f   : > { %v2908_v46 = vsel %vm1485_vm0, %v184_v33, %v520_v42 }
  0xa0   : > { %763 = vrot.lane.b32.xlu1 %v2902_v44, %s2577_s20  ;;  %761 = vrot.lane.b32.xlu0 %v2905_v45, %s2577_s20 }
  0xa2   : > { %v524_v49 = vpop.permute.xlu1 %523  ;;  %v522_v58 = vpop.permute.xlu0 %521 }
  0xa3   : > { %v2923_v8 = vsel %vm1485_vm0, %v186_v47, %v524_v49  ;;  %v2926_v10 = vsel %vm1485_vm0, %v185_v48, %v522_v58 }
  0xa4   : > { %767 = vrot.lane.b32.xlu1 %v2917_v62, %s2577_s20  ;;  %765 = vrot.lane.b32.xlu0 %v2920_v63, %s2577_s20 }
  0xa6   : > { %v2932_v42 = vpop.permute.xlu1 %527  ;;  %v2934_v16 = vpop.permute.xlu0 %525 }
  0xa7   : > { %4165 = vst [vmem:[#allocation25_spill] sm:$0xff] %v2932_v42  ;;  %4166 = vst [vmem:[#allocation26_spill] sm:$0xff] %v2934_v16 }
  0xa8   : > { %771 = vrot.lane.b32.xlu1 %v184_v33, %s2577_s20  ;;  %769 = vrot.lane.b32.xlu0 %v2937_v1, %s2577_s20  ;;  %v2954_v33 = vld [vmem:[%s2618_s17 + $0xc8] sm:$0xff] }
  0xa9   : > { %4169 = vst [vmem:[#allocation29_spill] sm:$0xff] %v2954_v33 }
  0xaa   : > { %v2942_v49 = vpop.permute.xlu1 %531  ;;  %v2944_v58 = vpop.permute.xlu0 %529 }
  0xab   : > { %4167 = vst [vmem:[#allocation27_spill] sm:$0xff] %v2942_v49  ;;  %4168 = vst [vmem:[#allocation28_spill] sm:$0xff] %v2944_v58  ;;  %v2972_v49 = vld [vmem:[%s2618_s17 + $0xe0] sm:$0xff]  ;;  %v2975_v58 = vld [vmem:[%s2618_s17 + $0xd8] sm:$0xff] }
  0xac   : > { %775 = vrot.lane.b32.xlu1 %v186_v47, %s2577_s20  ;;  %773 = vrot.lane.b32.xlu0 %v185_v48, %s2577_s20  ;;  %4171 = vst [vmem:[#allocation31_spill] sm:$0xff] %v2972_v49  ;;  %4172 = vst [vmem:[#allocation32_spill] sm:$0xff] %v2975_v58 }
  0xae   : > { %v2951_v60 = vpop.permute.xlu1 %535  ;;  %v534_v42 = vpop.permute.xlu0 %533 }
  0xaf   : > { %v2961_v59 = vsel %vm1485_vm0, %v2949_v15, %v534_v42 }
  0xb0   : > { %779 = vrot.lane.b32.xlu1 %v2954_v33, %s2577_s20  ;;  %777 = vrot.lane.b32.xlu0 %v2957_v3, %s2577_s20  ;;  %v2986_v3 = vld [vmem:[%s2618_s17 + $0xf8] sm:$0xff] }
  0xb2   : > { %v2967_v47 = vpop.permute.xlu1 %539  ;;  %v2969_v48 = vpop.permute.xlu0 %537 }
  0xb4   : > { %783 = vrot.lane.b32.xlu1 %v2972_v49, %s2577_s20  ;;  %781 = vrot.lane.b32.xlu0 %v2975_v58, %s2577_s20  ;;  %v2997_v58 = vld [vmem:[%s2618_s17 + $0x110] sm:$0xff] }
  0xb6   : > { %v2981_v42 = vpop.permute.xlu1 %543  ;;  %v2983_v33 = vpop.permute.xlu0 %541 }
  0xb8   : > { %787 = vrot.lane.b32.xlu1 %v2986_v3, %s2577_s20  ;;  %785 = vrot.lane.b32.xlu0 %v2949_v15, %s2577_s20 }
  0xba   : > { %v2992_v16 = vpop.permute.xlu1 %547  ;;  %v2994_v49 = vpop.permute.xlu0 %545 }
  0xbc   : > { %791 = vrot.lane.b32.xlu1 %v2997_v58, %s2577_s20  ;;  %789 = vrot.lane.b32.xlu0 %v3000_v61, %s2577_s20 }
  0xbe   : > { %v3006_v40 = vpop.permute.xlu1 %551  ;;  %v3008_v56 = vpop.permute.xlu0 %549 }
  0xbf   : > { %4173 = vst [vmem:[#allocation33_spill] sm:$0xff] %v3008_v56 }
  0xc0   : > { %795 = vrot.lane.b32.xlu1 %v3011_v41, %s2577_s20  ;;  %793 = vrot.lane.b32.xlu0 %v3014_v57, %s2577_s20 }
  0xc2   : > { %v556_v9 = vpop.permute.xlu1 %555  ;;  %v3021_v25 = vpop.permute.xlu0 %553 }
  0xc3   : > { %4174 = vst [vmem:[#allocation34_spill] sm:$0xff] %v3021_v25  ;;  %v3030_v55 = vsel %vm1485_vm0, %v202_v24, %v556_v9  ;;  %v1491_v25 = vsel %vm1485_vm0, %v2875_v27, %v2850_v11  ;;  %v1493_v11 = vsel %vm1485_vm0, %v2889_v31, %v2856_v13 }
  0xc4   : > { %4175 = vst [vmem:[#allocation35_spill] sm:$0xff] %v3030_v55  ;;  %799 = vrot.lane.b32.xlu1 %v3024_v38, %s2577_s20  ;;  %797 = vrot.lane.b32.xlu0 %v3027_v54, %s2577_s20  ;;  %v3055_v55 = vld [vmem:[%s2618_s17 + $0x168] sm:$0xff] }
  0xc5   : > { %4181 = vst [vmem:[#allocation41_spill] sm:$0xff] %v3055_v55 }
  0xc6   : > { %v3036_v22 = vpop.permute.xlu1 %623  ;;  %v3038_v39 = vpop.permute.xlu0 %621 }
  0xc7   : > { %4176 = vst [vmem:[#allocation36_spill] sm:$0xff] %v3036_v22  ;;  %4177 = vst [vmem:[#allocation37_spill] sm:$0xff] %v3038_v39  ;;  %v2245_v22 = vld [vmem:[%s2618_s17 + $0x188] sm:$0xff]  ;;  %v2244_v39 = vld [vmem:[%s2618_s17 + $0x180] sm:$0xff] }
  0xc8   : > { %803 = vrot.lane.b32.xlu1 %v3041_v23, %s2577_s20  ;;  %801 = vrot.lane.b32.xlu0 %v3044_v36, %s2577_s20 }
  0xca   : > { %v3050_v9 = vpop.permute.xlu1 %627  ;;  %v3052_v52 = vpop.permute.xlu0 %625 }
  0xcb   : > { %4179 = vst [vmem:[#allocation39_spill] sm:$0xff] %v3050_v9  ;;  %4180 = vst [vmem:[#allocation40_spill] sm:$0xff] %v3052_v52 }
  0xcc   : > { %807 = vrot.lane.b32.xlu1 %v202_v24, %s2577_s20  ;;  %805 = vrot.lane.b32.xlu0 %v3055_v55, %s2577_s20 }
  0xce   : > { %v632_v9 = vpop.permute.xlu1 %631  ;;  %v630_v52 = vpop.permute.xlu0 %629 }
  0xcf   : > { %v3069_v36 = vsel %vm1518_vm1, %v1491_v25, %v632_v9  ;;  %v3072_v24 = vsel %vm1518_vm1, %v1490_v53, %v630_v52 }
  0xd0   : > { %811 = vrot.lane.b32.xlu1 %v2245_v22, %s2577_s20  ;;  %809 = vrot.lane.b32.xlu0 %v2244_v39, %s2577_s20  ;;  %v1495_v22 = vsel %vm1485_vm0, %v2902_v44, %v2870_v17  ;;  %v1494_v39 = vsel %vm1485_vm0, %v2905_v45, %v2872_v26 }
  0xd2   : > { %v636_v55 = vpop.permute.xlu1 %635  ;;  %v634_v56 = vpop.permute.xlu0 %633 }
  0xd3   : > { %v3083_v25 = vsel %vm1518_vm1, %v1493_v11, %v636_v55  ;;  %v3086_v52 = vsel %vm1518_vm1, %v1492_v12, %v634_v56 }
  0xd4   : > { %879 = vrot.lane.b32.xlu1 %v2628_v2, %s2578_s21  ;;  %877 = vrot.lane.b32.xlu0 %v2621_v0, %s2578_s21  ;;  %v1497_v0 = vsel %vm1485_vm0, %v2917_v62, %v2884_v29  ;;  %v1496_v2 = vsel %vm1485_vm0, %v2920_v63, %v2886_v30  ;;  %v1498_v29 = vsel %vm1485_vm0, %v2937_v1, %v2899_v43 }
  0xd6   : > { %v640_v53 = vpop.permute.xlu1 %639  ;;  %v638_v55 = vpop.permute.xlu0 %637 }
  0xd7   : > { %v3099_v56 = vsel %vm1518_vm1, %v1495_v22, %v640_v53  ;;  %v3102_v13 = vsel %vm1518_vm1, %v1494_v39, %v638_v55 }
  0xd8   : > { %883 = vrot.lane.b32.xlu1 %v2635_v4, %s2578_s21  ;;  %881 = vrot.lane.b32.xlu0 %v2638_v5, %s2578_s21 }
  0xda   : > { %v644_v14 = vpop.permute.xlu1 %643  ;;  %v642_v17 = vpop.permute.xlu0 %641 }
  0xdb   : > { %v3115_v26 = vsel %vm1518_vm1, %v1497_v0, %v644_v14  ;;  %v3118_v9 = vsel %vm1518_vm1, %v1496_v2, %v642_v17  ;;  %v1510_v14 = vsel %vm1485_vm0, %v3014_v57, %v2983_v33 }
  0xdc   : > { %887 = vrot.lane.b32.xlu1 %v2645_v6, %s2578_s21  ;;  %885 = vrot.lane.b32.xlu0 %v2648_v7, %s2578_s21 }
  0xde   : > { %v648_v11 = vpop.permute.xlu1 %647  ;;  %v646_v30 = vpop.permute.xlu0 %645 }
  0xdf   : > { %v3129_v12 = vsel %vm1518_vm1, %v2908_v46, %v648_v11  ;;  %v3132_v22 = vsel %vm1518_vm1, %v1498_v29, %v646_v30  ;;  %v1751_v11 = vld [vmem:[%s4097_s1 + $0x10] sm:$0xff] }
  0xe0   : > { %911 = vrot.lane.b32.xlu1 %v2678_v18, %s2578_s21  ;;  %909 = vrot.lane.b32.xlu0 %v2681_v19, %s2578_s21 }
  0xe2   : > { %v652_v39 = vpop.permute.xlu1 %651  ;;  %v650_v53 = vpop.permute.xlu0 %649 }
  0xe3   : > { %v3140_v43 = vsel %vm1518_vm1, %v2923_v8, %v652_v39  ;;  %v3144_v55 = vsel %vm1518_vm1, %v2926_v10, %v650_v53  ;;  %v1513_v39 = vsel %vm1485_vm0, %v3024_v38, %v2992_v16  ;;  %v1512_v53 = vsel %vm1485_vm0, %v3027_v54, %v2994_v49  ;;  %v4182_v16 = vld [vmem:[#allocation33_spill] sm:$0xff]  ;;  %v4183_v49 = vld [vmem:[#allocation38_spill] sm:$0xff] }
  0xe4   : > { %1037 = vrot.lane.b32.xlu1 %v2793_v51, %s2579_s22  ;;  %1005 = vrot.lane.b32.xlu0 %v2737_v35, %s2579_s22  ;;  %v1507_v35 = vsel %vm1485_vm0, %v2986_v3, %v2951_v60  ;;  %v1508_v60 = vsel %vm1485_vm0, %v3000_v61, %v2969_v48  ;;  %v1511_v48 = vsel %vm1485_vm0, %v3011_v41, %v2981_v42 }
  0xe6   : > { %v3150_v18 = vpop.permute.xlu1 %655  ;;  %v3152_v19 = vpop.permute.xlu0 %653 }
  0xe8   : > { %1039 = vrot.lane.b32.xlu1 %v2790_v50, %s2579_s22  ;;  %1007 = vrot.lane.b32.xlu0 %v2734_v34, %s2579_s22 }
  0xea   : > { %v3158_v46 = vpop.permute.xlu1 %659  ;;  %v3160_v8 = vpop.permute.xlu0 %657 }
  0xec   : > { %1165 = vrot.lane.b32.xlu1 %v2949_v15, %s2580_s23  ;;  %1133 = vrot.lane.b32.xlu0 %v2878_v28, %s2580_s23  ;;  %v1509_v15 = vsel %vm1485_vm0, %v2997_v58, %v2967_v47 }
  0xee   : > { %v664_v51 = vpop.permute.xlu1 %663  ;;  %v662_v50 = vpop.permute.xlu0 %661 }
  0xef   : > { %v3170_v10 = vsel %vm1518_vm1, %v1507_v35, %v664_v51  ;;  %v3174_v34 = vsel %vm1518_vm1, %v2961_v59, %v662_v50  ;;  %v1749_v59 = vld [vmem:[%s4097_s1] sm:$0xff] }
  0xf0   : > { %1167 = vrot.lane.b32.xlu1 %v2986_v3, %s2580_s23  ;;  %1135 = vrot.lane.b32.xlu0 %v2875_v27, %s2580_s23  ;;  %v1750_v3 = vld [vmem:[%s4097_s1 + $0x8] sm:$0xff] }
  0xf1   : > { %v2535_v47 = vpack.c.bf16 %v1750_v3, %v1749_v59  ;;  %v4184_v3 = vld [vmem:[#allocation13_spill] sm:$0xff] }
  0xf2   : > { %v668_v28 = vpop.permute.xlu1 %667  ;;  %v666_v0 = vpop.permute.xlu0 %665 }
  0xf3   : > { %v3193_v27 = vsel %vm1518_vm1, %v1509_v15, %v668_v28  ;;  %v3196_v2 = vsel %vm1518_vm1, %v1508_v60, %v666_v0  ;;  %2536 = vmatprep.subr.bf16.mxu0 %v2535_v47  ;;  %2545 = vmatprep.subr.bf16.mxu1 %v2535_v47  ;;  %v1514_v15 = vsel %vm1485_vm0, %v4183_v49, %v4182_v16 }
  0xf4   : > { %1293 = vrot.lane.b32.xlu1 %v2691_v21, %s2581_s28  ;;  %1261 = vrot.lane.b32.xlu0 %v2638_v5, %s2581_s28  ;;  %v1752_v5 = vld [vmem:[%s4097_s1 + $0x18] sm:$0x7] }
  0xf5   : > { %2538 = vmatpush3.bf16.msra.mxu0 %v2535_v47  ;;  %2547 = vmatpush3.bf16.msra.mxu1 %v2535_v47  ;;  %v2539_v33 = vpack.c.bf16 %v1752_v5, %v1751_v11  ;;  %v4185_v47 = vld [vmem:[#allocation34_spill] sm:$0xff] }
  0xf6   : > { %v672_v17 = vpop.permute.xlu1 %671  ;;  %v670_v29 = vpop.permute.xlu0 %669 }
  0xf7   : > { %v3215_v30 = vsel %vm1518_vm1, %v1511_v48, %v672_v17  ;;  %v3218_v42 = vsel %vm1518_vm1, %v1510_v14, %v670_v29  ;;  %2541 = vmatprep.subr.msk.bf16.mxu0 %vm2540_vm4, %v2539_v33  ;;  %2546 = vmatprep.subr.msk.bf16.mxu1 %vm2540_vm4, %v2539_v33  ;;  %v4187_v29 = vld [vmem:[#allocation35_spill] sm:$0xff] }
  0xf8   : > { %1263 = vrot.lane.b32.xlu1 %v2635_v4, %s2581_s28  ;;  %913 = vrot.lane.b32.xlu0 %v2691_v21, %s2578_s21  ;;  %v1515_v21 = vsel %vm1485_vm0, %v3041_v23, %v3006_v40  ;;  %v4186_v40 = vld [vmem:[#allocation41_spill] sm:$0xff] }
  0xf9   : > { %2544 = vmatpush3.bf16.msk.msra.mxu0 %vm2540_vm4, %v2539_v33  ;;  %2548 = vmatpush3.bf16.msk.msra.mxu1 %vm2540_vm4, %v2539_v33  ;;  %v1516_v48 = vsel %vm1485_vm0, %v4186_v40, %v4185_v47  ;;  %v4190_v47 = vld [vmem:[#allocation4_spill] sm:$0xff] }
  0xfa   : > { %v676_v35 = vpop.permute.xlu1 %675  ;;  %v674_v51 = vpop.permute.xlu0 %673 }
  0xfb   : > { %v3231_v50 = vsel %vm1518_vm1, %v1513_v39, %v676_v35  ;;  %v3234_v4 = vsel %vm1518_vm1, %v1512_v53, %v674_v51  ;;  %v4188_v39 = vld [vmem:[#allocation12_spill] sm:$0xff]  ;;  %v4189_v53 = vld [vmem:[#allocation7_spill] sm:$0xff] }
  0xfc   : > { %1389 = vrot.lane.b32.xlu1 %v2747_v37, %s2583_s6  ;;  %1295 = vrot.lane.b32.xlu0 %v2688_v20, %s2581_s28 }
  0xfe   : > { %v680_v60 = vpop.permute.xlu1 %679  ;;  %v678_v28 = vpop.permute.xlu0 %677 }
  0xff   : > { %v3247_v0 = vsel %vm1518_vm1, %v1515_v21, %v680_v60  ;;  %v3250_v59 = vsel %vm1518_vm1, %v1514_v15, %v678_v28 }
 0x100   : > { %915 = vrot.lane.b32.xlu1 %v2688_v20, %s2578_s21  ;;  %1421 = vrot.lane.b32.xlu0 %v4184_v3, %s2583_s6 }
 0x102   : > { %v684_v14 = vpop.permute.xlu1 %683  ;;  %v682_v17 = vpop.permute.xlu0 %681 }
 0x103   : > { %v3261_v11 = vsel %vm1518_vm1, %v4187_v29, %v684_v14  ;;  %v3264_v5 = vsel %vm1518_vm1, %v1516_v48, %v682_v17  ;;  %v4193_v14 = vld [vmem:[#allocation9_spill] sm:$0xff] }
 0x104   : > { %1041 = vrot.lane.b32.xlu1 %v4184_v3, %s2579_s22  ;;  %1009 = vrot.lane.b32.xlu0 %v2747_v37, %s2579_s22 }
 0x106   : > { %v3270_v20 = vpop.permute.xlu1 %751  ;;  %v3272_v33 = vpop.permute.xlu0 %749 }
 0x108   : > { %1423 = vrot.lane.b32.xlu1 %v4188_v39, %s2583_s6  ;;  %1391 = vrot.lane.b32.xlu0 %v4189_v53, %s2583_s6 }
 0x10a   : > { %v3278_v35 = vpop.permute.xlu1 %755  ;;  %v3280_v51 = vpop.permute.xlu0 %753 }
 0x10c   : > { %1043 = vrot.lane.b32.xlu1 %v4188_v39, %s2579_s22  ;;  %1011 = vrot.lane.b32.xlu0 %v4189_v53, %s2579_s22 }
 0x10e   : > { %v760_v37 = vpop.permute.xlu1 %759  ;;  %v758_v21 = vpop.permute.xlu0 %757 }
 0x10f   : > { %v3288_v16 = vsel %vm1551_vm5, %v3069_v36, %v760_v37  ;;  %v3292_v15 = vsel %vm1551_vm5, %v3072_v24, %v758_v21  ;;  %v4198_v37 = vld [vmem:[#allocation14_spill] sm:$0xff]  ;;  %v4199_v21 = vld [vmem:[#allocation8_spill] sm:$0xff] }
 0x110   : > { %1169 = vrot.lane.b32.xlu1 %v3000_v61, %s2580_s23  ;;  %1137 = vrot.lane.b32.xlu0 %v2892_v32, %s2580_s23 }
 0x112   : > { %v764_v60 = vpop.permute.xlu1 %763  ;;  %v762_v28 = vpop.permute.xlu0 %761 }
 0x113   : > { %v3300_v3 = vsel %vm1551_vm5, %v3083_v25, %v764_v60  ;;  %v3304_v36 = vsel %vm1551_vm5, %v3086_v52, %v762_v28 }
 0x114   : > { %1171 = vrot.lane.b32.xlu1 %v2997_v58, %s2580_s23  ;;  %1139 = vrot.lane.b32.xlu0 %v2889_v31, %s2580_s23 }
 0x116   : > { %v768_v61 = vpop.permute.xlu1 %767  ;;  %v766_v24 = vpop.permute.xlu0 %765 }
 0x117   : > { %v3312_v32 = vsel %vm1551_vm5, %v3099_v56, %v768_v61  ;;  %v3316_v25 = vsel %vm1551_vm5, %v3102_v13, %v766_v24 }
 0x118   : > { %1297 = vrot.lane.b32.xlu1 %v4190_v47, %s2581_s28  ;;  %1265 = vrot.lane.b32.xlu0 %v2648_v7, %s2581_s28 }
 0x11a   : > { %v772_v58 = vpop.permute.xlu1 %771  ;;  %v770_v52 = vpop.permute.xlu0 %769 }
 0x11b   : > { %v3324_v31 = vsel %vm1551_vm5, %v3115_v26, %v772_v58  ;;  %v3328_v56 = vsel %vm1551_vm5, %v3118_v9, %v770_v52  ;;  %v4194_v9 = vld [vmem:[#allocation3_spill] sm:$0xff] }
 0x11c   : > { %1267 = vrot.lane.b32.xlu1 %v2645_v6, %s2581_s28  ;;  %917 = vrot.lane.b32.xlu0 %v4190_v47, %s2578_s21 }
 0x11e   : > { %v776_v13 = vpop.permute.xlu1 %775  ;;  %v774_v48 = vpop.permute.xlu0 %773 }
 0x11f   : > { %v3336_v7 = vsel %vm1551_vm5, %v3129_v12, %v776_v13  ;;  %v3340_v26 = vsel %vm1551_vm5, %v3132_v22, %v774_v48  ;;  %v4197_v22 = vld [vmem:[#allocation15_spill] sm:$0xff] }
 0x120   : > { %4191 = vst [vmem:[#allocation33_spill] sm:$0xff] %v3336_v7  ;;  %4192 = vst [vmem:[#allocation38_spill] sm:$0xff] %v3340_v26  ;;  %1393 = vrot.lane.b32.xlu1 %v4193_v14, %s2583_s6  ;;  %1299 = vrot.lane.b32.xlu0 %v4194_v9, %s2581_s28 }
 0x122   : > { %v780_v6 = vpop.permute.xlu1 %779  ;;  %v778_v17 = vpop.permute.xlu0 %777 }
 0x123   : > { %v3348_v29 = vsel %vm1551_vm5, %v3140_v43, %v780_v6  ;;  %v3352_v12 = vsel %vm1551_vm5, %v3144_v55, %v778_v17 }
 0x124   : > { %4195 = vst [vmem:[#allocation13_spill] sm:$0xff] %v3348_v29  ;;  %4196 = vst [vmem:[#allocation34_spill] sm:$0xff] %v3352_v12  ;;  %919 = vrot.lane.b32.xlu1 %v4194_v9, %s2578_s21  ;;  %1425 = vrot.lane.b32.xlu0 %v4197_v22, %s2583_s6  ;;  %v2349_v12 = vld [vmem:[%s2618_s17 + $0x81] sm:$0xff] }
 0x126   : > { %v3358_v39 = vpop.permute.xlu1 %783  ;;  %v3360_v53 = vpop.permute.xlu0 %781 }
 0x128   : > { %1045 = vrot.lane.b32.xlu1 %v4197_v22, %s2579_s22  ;;  %1013 = vrot.lane.b32.xlu0 %v4193_v14, %s2579_s22  ;;  %v4201_v14 = vld [vmem:[#allocation2_spill] sm:$0xff] }
 0x12a   : > { %v3366_v43 = vpop.permute.xlu1 %787  ;;  %v3368_v55 = vpop.permute.xlu0 %785 }
 0x12c   : > { %1427 = vrot.lane.b32.xlu1 %v4198_v37, %s2583_s6  ;;  %1395 = vrot.lane.b32.xlu0 %v4199_v21, %s2583_s6 }
 0x12e   : > { %v792_v60 = vpop.permute.xlu1 %791  ;;  %v790_v28 = vpop.permute.xlu0 %789 }
 0x12f   : > { %v3376_v61 = vsel %vm1551_vm5, %v3170_v10, %v792_v60  ;;  %v3380_v24 = vsel %vm1551_vm5, %v3174_v34, %v790_v28  ;;  %v4207_v28 = vld [vmem:[#allocation17_spill] sm:$0xff] }
 0x130   : > { %1047 = vrot.lane.b32.xlu1 %v4198_v37, %s2579_s22  ;;  %1015 = vrot.lane.b32.xlu0 %v4199_v21, %s2579_s22  ;;  %v4206_v21 = vld [vmem:[#allocation5_spill] sm:$0xff] }
 0x132   : > { %v796_v47 = vpop.permute.xlu1 %795  ;;  %v794_v58 = vpop.permute.xlu0 %793 }
 0x133   : > { %v3388_v52 = vsel %vm1551_vm5, %v3193_v27, %v796_v47  ;;  %v3392_v10 = vsel %vm1551_vm5, %v3196_v2, %v794_v58  ;;  %v4208_v47 = vld [vmem:[#allocation11_spill] sm:$0xff] }
 0x134   : > { %1173 = vrot.lane.b32.xlu1 %v3014_v57, %s2580_s23  ;;  %1141 = vrot.lane.b32.xlu0 %v2905_v45, %s2580_s23 }
 0x136   : > { %v800_v34 = vpop.permute.xlu1 %799  ;;  %v798_v13 = vpop.permute.xlu0 %797 }
 0x137   : > { %v3400_v48 = vsel %vm1551_vm5, %v3215_v30, %v800_v34  ;;  %v3404_v27 = vsel %vm1551_vm5, %v3218_v42, %v798_v13  ;;  %v4200_v42 = vld [vmem:[#allocation6_spill] sm:$0xff] }
 0x138   : > { %1175 = vrot.lane.b32.xlu1 %v3011_v41, %s2580_s23  ;;  %1143 = vrot.lane.b32.xlu0 %v2902_v44, %s2580_s23  ;;  %v2252_v41 = vld [vmem:[%s2618_s17 + $0x61] sm:$0xff] }
 0x13a   : > { %v804_v57 = vpop.permute.xlu1 %803  ;;  %v802_v2 = vpop.permute.xlu0 %801 }
 0x13b   : > { %v3412_v45 = vsel %vm1551_vm5, %v3231_v50, %v804_v57  ;;  %v3416_v30 = vsel %vm1551_vm5, %v3234_v4, %v802_v2  ;;  %v2347_v4 = vld [vmem:[%s2618_s17 + $0x69] sm:$0xff] }
 0x13c   : > { %1301 = vrot.lane.b32.xlu1 %v4200_v42, %s2581_s28  ;;  %1269 = vrot.lane.b32.xlu0 %v4201_v14, %s2581_s28  ;;  %v4209_v2 = vld [vmem:[#allocation16_spill] sm:$0xff] }
 0x13e   : > { %v808_v9 = vpop.permute.xlu1 %807  ;;  %v806_v6 = vpop.permute.xlu0 %805 }
 0x13f   : > { %v3425_v44 = vsel %vm1551_vm5, %v3247_v0, %v808_v9  ;;  %v3429_v50 = vsel %vm1551_vm5, %v3250_v59, %v806_v6 }
 0x140   : > { %4202 = vst [vmem:[#allocation41_spill] sm:$0xff] %v3425_v44  ;;  %4203 = vst [vmem:[#allocation35_spill] sm:$0xff] %v3429_v50  ;;  %921 = vrot.lane.b32.xlu1 %v4200_v42, %s2578_s21  ;;  %889 = vrot.lane.b32.xlu0 %v2252_v41, %s2578_s21  ;;  %v4210_v42 = vld [vmem:[#allocation10_spill] sm:$0xff] }
 0x141   : > { %v4215_v50 = vld [vmem:[#allocation18_spill] sm:$0xff] }
 0x142   : > { %v812_v17 = vpop.permute.xlu1 %811  ;;  %v810_v22 = vpop.permute.xlu0 %809 }
 0x143   : > { %v3437_v37 = vsel %vm1551_vm5, %v3261_v11, %v812_v17  ;;  %v3441_v0 = vsel %vm1551_vm5, %v3264_v5, %v810_v22  ;;  %v2364_v22 = vld [vmem:[%s2618_s17 + $0x139] sm:$0xff] }
 0x144   : > { %4204 = vst [vmem:[#allocation12_spill] sm:$0xff] %v3437_v37  ;;  %4205 = vst [vmem:[#allocation7_spill] sm:$0xff] %v3441_v0  ;;  %1303 = vrot.lane.b32.xlu1 %v4206_v21, %s2581_s28  ;;  %1271 = vrot.lane.b32.xlu0 %v2347_v4, %s2581_s28  ;;  %v2365_v37 = vld [vmem:[%s2618_s17 + $0x141] sm:$0xff] }
 0x146   : > { %v3446_v59 = vpop.permute.xlu1 %879  ;;  %v878_v60 = vpop.permute.xlu0 %877 }
 0x148   : > { %1429 = vrot.lane.b32.xlu1 %v4207_v28, %s2583_s6  ;;  %1397 = vrot.lane.b32.xlu0 %v4208_v47, %s2583_s6 }
 0x14a   : > { %v3452_v11 = vpop.permute.xlu1 %883  ;;  %v3454_v58 = vpop.permute.xlu0 %881 }
 0x14c   : > { %923 = vrot.lane.b32.xlu1 %v4206_v21, %s2578_s21  ;;  %891 = vrot.lane.b32.xlu0 %v2347_v4, %s2578_s21  ;;  %v2348_v21 = vld [vmem:[%s2618_s17 + $0x79] sm:$0xff] }
 0x14e   : > { %v3459_v5 = vpop.permute.xlu1 %887  ;;  %v3461_v34 = vpop.permute.xlu0 %885 }
 0x150   : > { %1049 = vrot.lane.b32.xlu1 %v4207_v28, %s2579_s22  ;;  %1017 = vrot.lane.b32.xlu0 %v4208_v47, %s2579_s22 }
 0x152   : > { %v3467_v13 = vpop.permute.xlu1 %911  ;;  %v910_v57 = vpop.permute.xlu0 %909 }
 0x154   : > { %1431 = vrot.lane.b32.xlu1 %v4209_v2, %s2583_s6  ;;  %1399 = vrot.lane.b32.xlu0 %v4210_v42, %s2583_s6 }
 0x156   : > { %v1038_v14 = vpop.permute.xlu1 %1037  ;;  %v1006_v41 = vpop.permute.xlu0 %1005 }
 0x158   : > { %1051 = vrot.lane.b32.xlu1 %v4209_v2, %s2579_s22  ;;  %1019 = vrot.lane.b32.xlu0 %v4210_v42, %s2579_s22  ;;  %v4211_v42 = vld [vmem:[#allocation20_spill] sm:$0xff] }
 0x15a   : > { %v3477_v9 = vpop.permute.xlu1 %1039  ;;  %v3479_v6 = vpop.permute.xlu0 %1007 }
 0x15c   : > { %1177 = vrot.lane.b32.xlu1 %v3027_v54, %s2580_s23  ;;  %1145 = vrot.lane.b32.xlu0 %v2920_v63, %s2580_s23  ;;  %v171_v54 = vld [vmem:[%s2618_s17] sm:$0xff] }
 0x15e   : > { %v1166_v4 = vpop.permute.xlu1 %1165  ;;  %v1134_v17 = vpop.permute.xlu0 %1133 }
 0x160   : > { %1179 = vrot.lane.b32.xlu1 %v3024_v38, %s2580_s23  ;;  %1147 = vrot.lane.b32.xlu0 %v2917_v62, %s2580_s23  ;;  %v1486_v38 = vsel %vm1485_vm0, %v171_v54, %v4211_v42  ;;  %v4212_v62 = vld [vmem:[#allocation37_spill] sm:$0xff]  ;;  %v4214_v42 = vld [vmem:[#allocation30_spill] sm:$0xff] }
 0x161   : > { %v1519_v29 = vsel %vm1518_vm1, %v1486_v38, %v4212_v62  ;;  %v2380_v62 = vld [vmem:[%s2618_s17 + $0x7a] sm:$0xff] }
 0x162   : > { %v3491_v28 = vpop.permute.xlu1 %1167  ;;  %v3493_v47 = vpop.permute.xlu0 %1135  ;;  %v1552_v0 = vsel %vm1551_vm5, %v1519_v29, %v3272_v33 }
 0x163   : > { %v1585_v54 = vsel %vm1584_vm6, %v1552_v0, %v878_v60 }
 0x164   : > { %1305 = vrot.lane.b32.xlu1 %v2364_v22, %s2581_s28  ;;  %1273 = vrot.lane.b32.xlu0 %v2348_v21, %s2581_s28  ;;  %v1618_v38 = vsel %vm1617_vm7, %v1585_v54, %v1006_v41 }
 0x165   : > { %v1651_v29 = vsel %vm1650_vm8, %v1618_v38, %v1134_v17  ;;  %v4216_v38 = vld [vmem:[#allocation22_spill] sm:$0xff] }
 0x166   : > { %v1294_v63 = vpop.permute.xlu1 %1293  ;;  %v1262_v2 = vpop.permute.xlu0 %1261 }
 0x167   : > { %v1684_v60 = vsel %vm1683_vm9, %v1651_v29, %v1262_v2 }
 0x168   : > { %925 = vrot.lane.b32.xlu1 %v2364_v22, %s2578_s21  ;;  %893 = vrot.lane.b32.xlu0 %v2348_v21, %s2578_s21  ;;  %v4213_v22 = vld [vmem:[#allocation26_spill] sm:$0xff] }
 0x169   : > { %v1502_v21 = vsel %vm1485_vm0, %v4214_v42, %v4213_v22 }
 0x16a   : > { %v1264_v7 = vpop.permute.xlu1 %1263  ;;  %v3508_v44 = vpop.permute.xlu0 %913  ;;  %v1535_v33 = vsel %vm1518_vm1, %v1502_v21, %v3152_v19  ;;  %v172_v19 = vld [vmem:[%s2618_s17 + $0x8] sm:$0xff] }
 0x16b   : > { %v1568_v0 = vsel %vm1551_vm5, %v1535_v33, %v3360_v53  ;;  %v4217_v33 = vld [vmem:[#allocation25_spill] sm:$0xff] }
 0x16c   : > { %1307 = vrot.lane.b32.xlu1 %v2365_v37, %s2581_s28  ;;  %1275 = vrot.lane.b32.xlu0 %v2349_v12, %s2581_s28  ;;  %v1601_v41 = vsel %vm1584_vm6, %v1568_v0, %v910_v57  ;;  %v2302_v0 = vld [vmem:[%s2618_s17 + $0x13a] sm:$0xff] }
 0x16d   : > { %v1634_v26 = vsel %vm1617_vm7, %v1601_v41, %v1038_v14  ;;  %v1487_v14 = vsel %vm1485_vm0, %v172_v19, %v4216_v38 }
 0x16e   : > { %v1390_v22 = vpop.permute.xlu1 %1389  ;;  %v1296_v42 = vpop.permute.xlu0 %1295  ;;  %v1667_v53 = vsel %vm1650_vm8, %v1634_v26, %v1166_v4  ;;  %v4219_v26 = vld [vmem:[#allocation36_spill] sm:$0xff] }
 0x16f   : > { %v1717_v54 = vsel %vm1716_vm10, %v1684_v60, %v1390_v22  ;;  %v1700_v17 = vsel %vm1683_vm9, %v1667_v53, %v1294_v63  ;;  %v1520_v4 = vsel %vm1518_vm1, %v1487_v14, %v4219_v26  ;;  %v2381_v53 = vld [vmem:[%s2618_s17 + $0x82] sm:$0xff] }
 0x170   : > { %1433 = vrot.lane.b32.xlu1 %v4215_v50, %s2583_s6  ;;  %1401 = vrot.lane.b32.xlu0 %v2380_v62, %s2583_s6  ;;  %v4218_v50 = vld [vmem:[#allocation29_spill] sm:$0xff]  ;;  %v1553_v60 = vsel %vm1551_vm5, %v1520_v4, %v3270_v20  ;;  %v4220_v4 = vld [vmem:[#allocation19_spill] sm:$0xff] }
 0x171   : > { %2487 = vmatprep.mubr.msk.f32.mxu0 %vm1760_vm11, %v1717_v54  ;;  %v1503_v29 = vsel %vm1485_vm0, %v4218_v50, %v4217_v33  ;;  %v2366_v33 = vld [vmem:[%s2618_s17 + $0x151] sm:$0xff] }
 0x172   : > { %v3534_v2 = vpop.permute.xlu1 %915  ;;  %v1422_v57 = vpop.permute.xlu0 %1421  ;;  %v1536_v63 = vsel %vm1518_vm1, %v1503_v29, %v3150_v18  ;;  %v2350_v50 = vld [vmem:[%s2618_s17 + $0x91] sm:$0xff] }
 0x173   : > { %v1733_v21 = vsel %vm1716_vm10, %v1700_v17, %v1422_v57  ;;  %v1569_v22 = vsel %vm1551_vm5, %v1536_v63, %v3358_v39  ;;  %v4221_v63 = vld [vmem:[#allocation23_spill] sm:$0xff] }
 0x174   : > { %927 = vrot.lane.b32.xlu1 %v2365_v37, %s2578_s21  ;;  %895 = vrot.lane.b32.xlu0 %v2349_v12, %s2578_s21  ;;  %v1586_v12 = vsel %vm1584_vm6, %v1553_v60, %v3446_v59  ;;  %v1602_v54 = vsel %vm1584_vm6, %v1569_v22, %v3467_v13  ;;  %v2397_v59 = vld [vmem:[%s2618_s17 + $0x142] sm:$0xff] }
 0x175   : > { %2511 = vmatprep.mubr.msk.f32.mxu1 %vm1760_vm11, %v1733_v21  ;;  %v1635_v18 = vsel %vm1617_vm7, %v1602_v54, %v3477_v9  ;;  %v1619_v19 = vsel %vm1617_vm7, %v1586_v12, %v3479_v6  ;;  %v4223_v54 = vld [vmem:[#allocation28_spill] sm:$0xff] }
 0x176   : > { %v1042_v37 = vpop.permute.xlu1 %1041  ;;  %v1010_v41 = vpop.permute.xlu0 %1009  ;;  %v1668_v20 = vsel %vm1650_vm8, %v1635_v18, %v3491_v28  ;;  %v1652_v39 = vsel %vm1650_vm8, %v1619_v19, %v3493_v47  ;;  %v4224_v18 = vld [vmem:[#allocation32_spill] sm:$0xff] }
 0x177   : > { %v1685_v13 = vsel %vm1683_vm9, %v1652_v39, %v1264_v7  ;;  %v1701_v17 = vsel %vm1683_vm9, %v1668_v20, %v1296_v42  ;;  %v2319_v42 = vld [vmem:[%s2618_s17 + $0x98] sm:$0xff]  ;;  %v1504_v19 = vsel %vm1485_vm0, %v4224_v18, %v4223_v54 }
 0x178   : > { %1053 = vrot.lane.b32.xlu1 %v2302_v0, %s2579_s22  ;;  %1021 = vrot.lane.b32.xlu0 %v2380_v62, %s2579_s22 }
 0x17a   : > { %v1424_v9 = vpop.permute.xlu1 %1423  ;;  %v1392_v57 = vpop.permute.xlu0 %1391 }
 0x17b   : > { %v1734_v6 = vsel %vm1716_vm10, %v1701_v17, %v1424_v9  ;;  %v1718_v21 = vsel %vm1716_vm10, %v1685_v13, %v1392_v57 }
 0x17c   : > { %1435 = vrot.lane.b32.xlu1 %v2397_v59, %s2583_s6  ;;  %1403 = vrot.lane.b32.xlu0 %v2381_v53, %s2583_s6 }
 0x17d   : > { %2488 = vmatmul.mubr.msk.f32.vlgmr.msra.gmra.mrb[0].mxu0 %vm1760_vm11, %v1718_v21  ;;  %2512 = vmatmul.mubr.msk.f32.vlgmr.msra.gmra.mrb[0].mxu1 %vm1760_vm11, %v1734_v6  ;;  %v2382_v21 = vld [vmem:[%s2618_s17 + $0x92] sm:$0xff] }
 0x17e   : > { %v3578_v7 = vpop.permute.xlu1 %1043  ;;  %v3580_v28 = vpop.permute.xlu0 %1011 }
 0x180   : > { %1055 = vrot.lane.b32.xlu1 %v2397_v59, %s2579_s22  ;;  %1023 = vrot.lane.b32.xlu0 %v2381_v53, %s2579_s22  ;;  %v2367_v59 = vld [vmem:[%s2618_s17 + $0x159] sm:$0xff] }
 0x181   : > { %v2351_v53 = vld [vmem:[%s2618_s17 + $0x99] sm:$0xff] }
 0x182   : > { %v1170_v47 = vpop.permute.xlu1 %1169  ;;  %v1138_v62 = vpop.permute.xlu0 %1137 }
 0x184   : > { %1181 = vrot.lane.b32.xlu1 %v4183_v49, %s2580_s23  ;;  %1149 = vrot.lane.b32.xlu0 %v2937_v1, %s2580_s23  ;;  %v1488_v49 = vsel %vm1485_vm0, %v4221_v63, %v4220_v4  ;;  %v4222_v1 = vld [vmem:[#allocation40_spill] sm:$0xff]  ;;  %v4227_v4 = vld [vmem:[#allocation27_spill] sm:$0xff] }
 0x185   : > { %v1521_v0 = vsel %vm1518_vm1, %v1488_v49, %v4222_v1  ;;  %v4228_v63 = vld [vmem:[#allocation31_spill] sm:$0xff] }
 0x186   : > { %v1172_v38 = vpop.permute.xlu1 %1171  ;;  %v1140_v14 = vpop.permute.xlu0 %1139  ;;  %v1505_v49 = vsel %vm1485_vm0, %v4228_v63, %v4227_v4 }
 0x187   : > { %v1538_v1 = vsel %vm1518_vm1, %v1505_v49, %v3158_v46 }
 0x188   : > { %1183 = vrot.lane.b32.xlu1 %v3041_v23, %s2580_s23  ;;  %1151 = vrot.lane.b32.xlu0 %v2319_v42, %s2580_s23  ;;  %v1554_v23 = vsel %vm1551_vm5, %v1521_v0, %v3280_v51  ;;  %v1537_v51 = vsel %vm1518_vm1, %v1504_v19, %v3160_v8 }
 0x189   : > { %v1587_v12 = vsel %vm1584_vm6, %v1554_v23, %v3454_v58  ;;  %v1570_v58 = vsel %vm1551_vm5, %v1537_v51, %v3368_v55  ;;  %v2398_v55 = vld [vmem:[%s2618_s17 + $0x152] sm:$0xff]  ;;  %v1571_v23 = vsel %vm1551_vm5, %v1538_v1, %v3366_v43 }
 0x18a   : > { %v1298_v29 = vpop.permute.xlu1 %1297  ;;  %v1266_v26 = vpop.permute.xlu0 %1265  ;;  %v1620_v20 = vsel %vm1617_vm7, %v1587_v12, %v1010_v41  ;;  %v1603_v9 = vsel %vm1584_vm6, %v1570_v58, %v3508_v44  ;;  %v1604_v19 = vsel %vm1584_vm6, %v1571_v23, %v3534_v2  ;;  %v2400_v23 = vld [vmem:[%s2618_s17 + $0x16a] sm:$0xff] }
 0x18b   : > { %v1653_v39 = vsel %vm1650_vm8, %v1620_v20, %v1138_v62  ;;  %v1636_v6 = vsel %vm1617_vm7, %v1603_v9, %v1042_v37  ;;  %v1637_v20 = vsel %vm1617_vm7, %v1604_v19, %v3578_v7  ;;  %v2337_v9 = vld [vmem:[%s2618_s17 + $0x170] sm:$0xff] }
 0x18c   : > { %1309 = vrot.lane.b32.xlu1 %v2366_v33, %s2581_s28  ;;  %1277 = vrot.lane.b32.xlu0 %v2350_v50, %s2581_s28  ;;  %v1686_v13 = vsel %vm1683_vm9, %v1653_v39, %v1266_v26  ;;  %v1669_v8 = vsel %vm1650_vm8, %v1636_v6, %v1170_v47  ;;  %v4226_v26 = vld [vmem:[#allocation24_spill] sm:$0xff]  ;;  %v4229_v47 = vld [vmem:[#allocation39_spill] sm:$0xff] }
 0x18d   : > { %v1702_v62 = vsel %vm1683_vm9, %v1669_v8, %v1298_v29 }
 0x18e   : > { %v1268_v60 = vpop.permute.xlu1 %1267  ;;  %v3603_v22 = vpop.permute.xlu0 %917 }
 0x190   : > { %929 = vrot.lane.b32.xlu1 %v2366_v33, %s2578_s21  ;;  %897 = vrot.lane.b32.xlu0 %v2350_v50, %s2578_s21  ;;  %v4225_v50 = vld [vmem:[#allocation21_spill] sm:$0xff] }
 0x191   : > { %v1489_v37 = vsel %vm1485_vm0, %v4226_v26, %v4225_v50  ;;  %v1589_v50 = vsel %vm1584_vm6, %v3292_v15, %v3461_v34  ;;  %v1605_v26 = vsel %vm1584_vm6, %v3380_v24, %v3603_v22  ;;  %v2353_v15 = vld [vmem:[%s2618_s17 + $0xb1] sm:$0xff] }
 0x192   : > { %v1394_v17 = vpop.permute.xlu1 %1393  ;;  %v1300_v41 = vpop.permute.xlu0 %1299  ;;  %v1522_v29 = vsel %vm1518_vm1, %v1489_v37, %v4229_v47  ;;  %v2369_v47 = vld [vmem:[%s2618_s17 + $0x171] sm:$0xff] }
 0x193   : > { %v1719_v57 = vsel %vm1716_vm10, %v1686_v13, %v1394_v17  ;;  %v1555_v0 = vsel %vm1551_vm5, %v1522_v29, %v3278_v35  ;;  %v1670_v35 = vsel %vm1650_vm8, %v1637_v20, %v1172_v38  ;;  %v2399_v38 = vld [vmem:[%s2618_s17 + $0x15a] sm:$0xff]  ;;  %v2320_v13 = vld [vmem:[%s2618_s17 + $0xa8] sm:$0xff] }
 0x194   : > { %1311 = vrot.lane.b32.xlu1 %v2367_v59, %s2581_s28  ;;  %1279 = vrot.lane.b32.xlu0 %v2351_v53, %s2581_s28  ;;  %v1588_v18 = vsel %vm1584_vm6, %v1555_v0, %v3452_v11  ;;  %v1703_v2 = vsel %vm1683_vm9, %v1670_v35, %v1300_v41 }
 0x195   : > { %2490 = vmatprep.mubr.msk.f32.mxu0 %vm1760_vm11, %v1719_v57  ;;  %v1621_v46 = vsel %vm1617_vm7, %v1588_v18, %v3580_v28  ;;  %v2321_v57 = vld [vmem:[%s2618_s17 + $0xb0] sm:$0xff] }
 0x196   : > { %v3632_v42 = vpop.permute.xlu1 %919  ;;  %v1426_v33 = vpop.permute.xlu0 %1425  ;;  %v1654_v43 = vsel %vm1650_vm8, %v1621_v46, %v1140_v14  ;;  %v2383_v14 = vld [vmem:[%s2618_s17 + $0x9a] sm:$0xff]  ;;  %v1590_v46 = vsel %vm1584_vm6, %v3288_v16, %v3459_v5 }
 0x197   : > { %v1735_v44 = vsel %vm1716_vm10, %v1702_v62, %v1426_v33  ;;  %v1687_v11 = vsel %vm1683_vm9, %v1654_v43, %v1268_v60  ;;  %v1606_v35 = vsel %vm1584_vm6, %v3376_v61, %v3632_v42 }
 0x198   : > { %1437 = vrot.lane.b32.xlu1 %v2398_v55, %s2583_s6  ;;  %1405 = vrot.lane.b32.xlu0 %v2382_v21, %s2583_s6 }
 0x199   : > { %2514 = vmatprep.mubr.msk.f32.mxu1 %vm1760_vm11, %v1735_v44 }
 0x19a   : > { %v1046_v12 = vpop.permute.xlu1 %1045  ;;  %v1014_v54 = vpop.permute.xlu0 %1013 }
 0x19b   : > { %v1638_v37 = vsel %vm1617_vm7, %v1605_v26, %v1046_v12  ;;  %v1622_v4 = vsel %vm1617_vm7, %v1589_v50, %v1014_v54  ;;  %v2384_v12 = vld [vmem:[%s2618_s17 + $0xaa] sm:$0xff] }
 0x19c   : > { %931 = vrot.lane.b32.xlu1 %v2367_v59, %s2578_s21  ;;  %899 = vrot.lane.b32.xlu0 %v2351_v53, %s2578_s21 }
 0x19e   : > { %v1428_v51 = vpop.permute.xlu1 %1427  ;;  %v1396_v39 = vpop.permute.xlu0 %1395 }
 0x19f   : > { %v1736_v7 = vsel %vm1716_vm10, %v1703_v2, %v1428_v51  ;;  %v1720_v28 = vsel %vm1716_vm10, %v1687_v11, %v1396_v39 }
 0x1a0   : > { %1057 = vrot.lane.b32.xlu1 %v2398_v55, %s2579_s22  ;;  %1025 = vrot.lane.b32.xlu0 %v2382_v21, %s2579_s22  ;;  %v2368_v55 = vld [vmem:[%s2618_s17 + $0x169] sm:$0xff] }
 0x1a1   : > { %2491 = vmatmul.mubr.msk.f32.gmra.mrb[2].mxu0 %vm1760_vm11, %v1720_v28  ;;  %2515 = vmatmul.mubr.msk.f32.gmra.mrb[2].mxu1 %vm1760_vm11, %v1736_v7  ;;  %v2352_v21 = vld [vmem:[%s2618_s17 + $0xa9] sm:$0xff]  ;;  %v2401_v28 = vld [vmem:[%s2618_s17 + $0x172] sm:$0xff] }
 0x1a2   : > { %v1048_v60 = vpop.permute.xlu1 %1047  ;;  %v1016_v59 = vpop.permute.xlu0 %1015 }
 0x1a3   : > { %v1639_v43 = vsel %vm1617_vm7, %v1606_v35, %v1048_v60  ;;  %v1623_v11 = vsel %vm1617_vm7, %v1590_v46, %v1016_v59 }
 0x1a4   : > { %1439 = vrot.lane.b32.xlu1 %v2399_v38, %s2583_s6  ;;  %1407 = vrot.lane.b32.xlu0 %v2383_v14, %s2583_s6 }
 0x1a6   : > { %v1174_v53 = vpop.permute.xlu1 %1173  ;;  %v1142_v58 = vpop.permute.xlu0 %1141 }
 0x1a7   : > { %v1671_v63 = vsel %vm1650_vm8, %v1638_v37, %v1174_v53  ;;  %v1655_v49 = vsel %vm1650_vm8, %v1622_v4, %v1142_v58  ;;  %v2338_v58 = vld [vmem:[%s2618_s17 + $0x180] sm:$0xff] }
 0x1a8   : > { %1059 = vrot.lane.b32.xlu1 %v2399_v38, %s2579_s22  ;;  %1027 = vrot.lane.b32.xlu0 %v2383_v14, %s2579_s22  ;;  %v2385_v38 = vld [vmem:[%s2618_s17 + $0xb2] sm:$0xff] }
 0x1aa   : > { %v1176_v17 = vpop.permute.xlu1 %1175  ;;  %v1144_v41 = vpop.permute.xlu0 %1143 }
 0x1ab   : > { %v1672_v2 = vsel %vm1650_vm8, %v1639_v43, %v1176_v17  ;;  %v1656_v51 = vsel %vm1650_vm8, %v1623_v11, %v1144_v41 }
 0x1ac   : > { %1185 = vrot.lane.b32.xlu1 %v4186_v40, %s2580_s23  ;;  %1153 = vrot.lane.b32.xlu0 %v2320_v13, %s2580_s23  ;;  %v2322_v13 = vld [vmem:[%s2618_s17 + $0xc0] sm:$0xff] }
 0x1ae   : > { %v1302_v6 = vpop.permute.xlu1 %1301  ;;  %v1270_v8 = vpop.permute.xlu0 %1269 }
 0x1af   : > { %v1704_v34 = vsel %vm1683_vm9, %v1671_v63, %v1302_v6  ;;  %v1688_v24 = vsel %vm1683_vm9, %v1655_v49, %v1270_v8 }
 0x1b0   : > { %1187 = vrot.lane.b32.xlu1 %v2337_v9, %s2580_s23  ;;  %1155 = vrot.lane.b32.xlu0 %v2321_v57, %s2580_s23  ;;  %v2339_v9 = vld [vmem:[%s2618_s17 + $0x188] sm:$0xff] }
 0x1b1   : > { %v2323_v57 = vld [vmem:[%s2618_s17 + $0xc8] sm:$0xff] }
 0x1b2   : > { %v3688_v62 = vpop.permute.xlu1 %921  ;;  %v3690_v33 = vpop.permute.xlu0 %889 }
 0x1b3   : > { %v1607_v37 = vsel %vm1584_vm6, %v3392_v10, %v3688_v62  ;;  %v1591_v4 = vsel %vm1584_vm6, %v3304_v36, %v3690_v33  ;;  %v2355_v10 = vld [vmem:[%s2618_s17 + $0xc9] sm:$0xff] }
 0x1b4   : > { %1313 = vrot.lane.b32.xlu1 %v2368_v55, %s2581_s28  ;;  %1281 = vrot.lane.b32.xlu0 %v2352_v21, %s2581_s28 }
 0x1b6   : > { %v1304_v40 = vpop.permute.xlu1 %1303  ;;  %v1272_v44 = vpop.permute.xlu0 %1271 }
 0x1b7   : > { %v1705_v16 = vsel %vm1683_vm9, %v1672_v2, %v1304_v40  ;;  %v1689_v5 = vsel %vm1683_vm9, %v1656_v51, %v1272_v44 }
 0x1b8   : > { %933 = vrot.lane.b32.xlu1 %v2368_v55, %s2578_s21  ;;  %901 = vrot.lane.b32.xlu0 %v2352_v21, %s2578_s21  ;;  %v2370_v55 = vld [vmem:[%s2618_s17 + $0x181] sm:$0xff] }
 0x1b9   : > { %v2354_v21 = vld [vmem:[%s2618_s17 + $0xc1] sm:$0xff] }
 0x1ba   : > { %v1430_v22 = vpop.permute.xlu1 %1429  ;;  %v1398_v29 = vpop.permute.xlu0 %1397 }
 0x1bb   : > { %v1737_v1 = vsel %vm1716_vm10, %v1704_v34, %v1430_v22  ;;  %v1721_v0 = vsel %vm1716_vm10, %v1688_v24, %v1398_v29  ;;  %v2371_v34 = vld [vmem:[%s2618_s17 + $0x189] sm:$0xff] }
 0x1bc   : > { %1315 = vrot.lane.b32.xlu1 %v2369_v47, %s2581_s28  ;;  %1283 = vrot.lane.b32.xlu0 %v2353_v15, %s2581_s28 }
 0x1bd   : > { %2493 = vmatprep.mubr.msk.f32.mxu0 %vm1760_vm11, %v1721_v0  ;;  %2517 = vmatprep.mubr.msk.f32.mxu1 %vm1760_vm11, %v1737_v1  ;;  %v2402_v1 = vld [vmem:[%s2618_s17 + $0x182] sm:$0xff] }
 0x1be   : > { %v3718_v54 = vpop.permute.xlu1 %923  ;;  %v3720_v18 = vpop.permute.xlu0 %891  ;;  %v2386_v0 = vld [vmem:[%s2618_s17 + $0xc2] sm:$0xff] }
 0x1bf   : > { %v1608_v46 = vsel %vm1584_vm6, %v3388_v52, %v3718_v54  ;;  %v1592_v35 = vsel %vm1584_vm6, %v3300_v3, %v3720_v18 }
 0x1c0   : > { %1441 = vrot.lane.b32.xlu1 %v2400_v23, %s2583_s6  ;;  %1409 = vrot.lane.b32.xlu0 %v2384_v12, %s2583_s6 }
 0x1c2   : > { %v1050_v19 = vpop.permute.xlu1 %1049  ;;  %v1018_v20 = vpop.permute.xlu0 %1017 }
 0x1c3   : > { %v1640_v63 = vsel %vm1617_vm7, %v1607_v37, %v1050_v19  ;;  %v1624_v49 = vsel %vm1617_vm7, %v1591_v4, %v1018_v20 }
 0x1c4   : > { %935 = vrot.lane.b32.xlu1 %v2369_v47, %s2578_s21  ;;  %903 = vrot.lane.b32.xlu0 %v2353_v15, %s2578_s21 }
 0x1c6   : > { %v1432_v39 = vpop.permute.xlu1 %1431  ;;  %v1400_v61 = vpop.permute.xlu0 %1399 }
 0x1c7   : > { %v1738_v42 = vsel %vm1716_vm10, %v1705_v16, %v1432_v39  ;;  %v1722_v7 = vsel %vm1716_vm10, %v1689_v5, %v1400_v61  ;;  %v2403_v39 = vld [vmem:[%s2618_s17 + $0x18a] sm:$0xff] }
 0x1c8   : > { %1061 = vrot.lane.b32.xlu1 %v2400_v23, %s2579_s22  ;;  %1029 = vrot.lane.b32.xlu0 %v2384_v12, %s2579_s22  ;;  %v2387_v61 = vld [vmem:[%s2618_s17 + $0xca] sm:$0xff] }
 0x1c9   : > { %2494 = vmatmul.mubr.msk.f32.gmra.mrb[4].mxu0 %vm1760_vm11, %v1722_v7  ;;  %2518 = vmatmul.mubr.msk.f32.gmra.mrb[4].mxu1 %vm1760_vm11, %v1738_v42 }
 0x1ca   : > { %v1052_v14 = vpop.permute.xlu1 %1051  ;;  %v1020_v60 = vpop.permute.xlu0 %1019 }
 0x1cb   : > { %v1641_v43 = vsel %vm1617_vm7, %v1608_v46, %v1052_v14  ;;  %v1625_v11 = vsel %vm1617_vm7, %v1592_v35, %v1020_v60  ;;  %v2340_v14 = vld [vmem:[%s2618_s17 + $0x198] sm:$0xff] }
 0x1cc   : > { %1443 = vrot.lane.b32.xlu1 %v2401_v28, %s2583_s6  ;;  %1411 = vrot.lane.b32.xlu0 %v2385_v38, %s2583_s6  ;;  %v2324_v60 = vld [vmem:[%s2618_s17 + $0xd8] sm:$0xff] }
 0x1ce   : > { %v1178_v59 = vpop.permute.xlu1 %1177  ;;  %v1146_v53 = vpop.permute.xlu0 %1145 }
 0x1cf   : > { %v1673_v47 = vsel %vm1650_vm8, %v1640_v63, %v1178_v59  ;;  %v1657_v15 = vsel %vm1650_vm8, %v1624_v49, %v1146_v53 }
 0x1d0   : > { %1063 = vrot.lane.b32.xlu1 %v2401_v28, %s2579_s22  ;;  %1031 = vrot.lane.b32.xlu0 %v2385_v38, %s2579_s22 }
 0x1d2   : > { %v1180_v17 = vpop.permute.xlu1 %1179  ;;  %v1148_v41 = vpop.permute.xlu0 %1147 }
 0x1d3   : > { %v1674_v2 = vsel %vm1650_vm8, %v1641_v43, %v1180_v17  ;;  %v1658_v51 = vsel %vm1650_vm8, %v1625_v11, %v1148_v41 }
 0x1d4   : > { %1189 = vrot.lane.b32.xlu1 %v2338_v58, %s2580_s23  ;;  %1157 = vrot.lane.b32.xlu0 %v2322_v13, %s2580_s23  ;;  %v2341_v58 = vld [vmem:[%s2618_s17 + $0x1a0] sm:$0xff] }
 0x1d5   : > { %v2325_v13 = vld [vmem:[%s2618_s17 + $0xe0] sm:$0xff] }
 0x1d6   : > { %v1306_v6 = vpop.permute.xlu1 %1305  ;;  %v1274_v8 = vpop.permute.xlu0 %1273 }
 0x1d7   : > { %v1706_v62 = vsel %vm1683_vm9, %v1673_v47, %v1306_v6  ;;  %v1690_v36 = vsel %vm1683_vm9, %v1657_v15, %v1274_v8 }
 0x1d8   : > { %1191 = vrot.lane.b32.xlu1 %v2339_v9, %s2580_s23  ;;  %1159 = vrot.lane.b32.xlu0 %v2323_v57, %s2580_s23  ;;  %v2372_v9 = vld [vmem:[%s2618_s17 + $0x199] sm:$0xff] }
 0x1d9   : > { %v2356_v57 = vld [vmem:[%s2618_s17 + $0xd9] sm:$0xff] }
 0x1da   : > { %v3760_v40 = vpop.permute.xlu1 %925  ;;  %v3762_v44 = vpop.permute.xlu0 %893 }
 0x1db   : > { %v1609_v37 = vsel %vm1584_vm6, %v3404_v27, %v3760_v40  ;;  %v1593_v4 = vsel %vm1584_vm6, %v3316_v25, %v3762_v44  ;;  %v2388_v27 = vld [vmem:[%s2618_s17 + $0xda] sm:$0xff] }
 0x1dc   : > { %1317 = vrot.lane.b32.xlu1 %v2370_v55, %s2581_s28  ;;  %1285 = vrot.lane.b32.xlu0 %v2354_v21, %s2581_s28 }
 0x1de   : > { %v1308_v50 = vpop.permute.xlu1 %1307  ;;  %v1276_v26 = vpop.permute.xlu0 %1275 }
 0x1df   : > { %v1707_v52 = vsel %vm1683_vm9, %v1674_v2, %v1308_v50  ;;  %v1691_v54 = vsel %vm1683_vm9, %v1658_v51, %v1276_v26 }
 0x1e0   : > { %937 = vrot.lane.b32.xlu1 %v2370_v55, %s2578_s21  ;;  %905 = vrot.lane.b32.xlu0 %v2354_v21, %s2578_s21  ;;  %v2373_v55 = vld [vmem:[%s2618_s17 + $0x1a1] sm:$0xff] }
 0x1e1   : > { %v2357_v21 = vld [vmem:[%s2618_s17 + $0xe1] sm:$0xff] }
 0x1e2   : > { %v1434_v33 = vpop.permute.xlu1 %1433  ;;  %v1402_v24 = vpop.permute.xlu0 %1401 }
 0x1e3   : > { %v1739_v22 = vsel %vm1716_vm10, %v1706_v62, %v1434_v33  ;;  %v1723_v29 = vsel %vm1716_vm10, %v1690_v36, %v1402_v24  ;;  %v2405_v33 = vld [vmem:[%s2618_s17 + $0x1a2] sm:$0xff] }
 0x1e4   : > { %1319 = vrot.lane.b32.xlu1 %v2371_v34, %s2581_s28  ;;  %1287 = vrot.lane.b32.xlu0 %v2355_v10, %s2581_s28  ;;  %v2389_v24 = vld [vmem:[%s2618_s17 + $0xe2] sm:$0xff] }
 0x1e5   : > { %2496 = vmatprep.mubr.msk.f32.mxu0 %vm1760_vm11, %v1723_v29  ;;  %2520 = vmatprep.mubr.msk.f32.mxu1 %vm1760_vm11, %v1739_v22 }
 0x1e6   : > { %v3790_v23 = vpop.permute.xlu1 %927  ;;  %v3792_v12 = vpop.permute.xlu0 %895 }
 0x1e8   : > { %1445 = vrot.lane.b32.xlu1 %v2402_v1, %s2583_s6  ;;  %1413 = vrot.lane.b32.xlu0 %v2386_v0, %s2583_s6 }
 0x1ea   : > { %v1054_v19 = vpop.permute.xlu1 %1053  ;;  %v1022_v20 = vpop.permute.xlu0 %1021 }
 0x1eb   : > { %v1642_v63 = vsel %vm1617_vm7, %v1609_v37, %v1054_v19  ;;  %v1626_v49 = vsel %vm1617_vm7, %v1593_v4, %v1022_v20  ;;  %v1610_v19 = vsel %vm1584_vm6, %v3400_v48, %v3790_v23  ;;  %v1594_v20 = vsel %vm1584_vm6, %v3312_v32, %v3792_v12 }
 0x1ec   : > { %939 = vrot.lane.b32.xlu1 %v2371_v34, %s2578_s21  ;;  %907 = vrot.lane.b32.xlu0 %v2355_v10, %s2578_s21  ;;  %v2404_v34 = vld [vmem:[%s2618_s17 + $0x19a] sm:$0xff] }
 0x1ee   : > { %v1436_v16 = vpop.permute.xlu1 %1435  ;;  %v1404_v3 = vpop.permute.xlu0 %1403 }
 0x1ef   : > { %v1740_v18 = vsel %vm1716_vm10, %v1707_v52, %v1436_v16  ;;  %v1724_v5 = vsel %vm1716_vm10, %v1691_v54, %v1404_v3 }
 0x1f0   : > { %1065 = vrot.lane.b32.xlu1 %v2402_v1, %s2579_s22  ;;  %1033 = vrot.lane.b32.xlu0 %v2386_v0, %s2579_s22 }
 0x1f1   : > { %2497 = vmatmul.mubr.msk.f32.gmra.mrb[6].mxu0 %vm1760_vm11, %v1724_v5  ;;  %2521 = vmatmul.mubr.msk.f32.gmra.mrb[6].mxu1 %vm1760_vm11, %v1740_v18 }
 0x1f2   : > { %v1056_v42 = vpop.permute.xlu1 %1055  ;;  %v1024_v7 = vpop.permute.xlu0 %1023 }
 0x1f3   : > { %v1643_v46 = vsel %vm1617_vm7, %v1610_v19, %v1056_v42  ;;  %v1627_v35 = vsel %vm1617_vm7, %v1594_v20, %v1024_v7 }
 0x1f4   : > { %1447 = vrot.lane.b32.xlu1 %v2403_v39, %s2583_s6  ;;  %1415 = vrot.lane.b32.xlu0 %v2387_v61, %s2583_s6 }
 0x1f6   : > { %v1182_v28 = vpop.permute.xlu1 %1181  ;;  %v1150_v38 = vpop.permute.xlu0 %1149 }
 0x1f7   : > { %v1675_v47 = vsel %vm1650_vm8, %v1642_v63, %v1182_v28  ;;  %v1659_v15 = vsel %vm1650_vm8, %v1626_v49, %v1150_v38 }
 0x1f8   : > { %1067 = vrot.lane.b32.xlu1 %v2403_v39, %s2579_s22  ;;  %1035 = vrot.lane.b32.xlu0 %v2387_v61, %s2579_s22 }
 0x1fa   : > { %v1184_v59 = vpop.permute.xlu1 %1183  ;;  %v1152_v53 = vpop.permute.xlu0 %1151 }
 0x1fb   : > { %v1676_v43 = vsel %vm1650_vm8, %v1643_v46, %v1184_v59  ;;  %v1660_v11 = vsel %vm1650_vm8, %v1627_v35, %v1152_v53 }
 0x1fc   : > { %1193 = vrot.lane.b32.xlu1 %v2340_v14, %s2580_s23  ;;  %1161 = vrot.lane.b32.xlu0 %v2324_v60, %s2580_s23 }
 0x1fe   : > { %v1310_v17 = vpop.permute.xlu1 %1309  ;;  %v1278_v41 = vpop.permute.xlu0 %1277 }
 0x1ff   : > { %v1708_v40 = vsel %vm1683_vm9, %v1675_v47, %v1310_v17  ;;  %v1692_v25 = vsel %vm1683_vm9, %v1659_v15, %v1278_v41 }
 0x200   : > { %1195 = vrot.lane.b32.xlu1 %v2341_v58, %s2580_s23  ;;  %1163 = vrot.lane.b32.xlu0 %v2325_v13, %s2580_s23 }
 0x202   : > { %v3832_v6 = vpop.permute.xlu1 %929  ;;  %v3834_v8 = vpop.permute.xlu0 %897 }
 0x203   : > { %v1611_v14 = vsel %vm1584_vm6, %v3416_v30, %v3832_v6  ;;  %v1595_v60 = vsel %vm1584_vm6, %v3328_v56, %v3834_v8 }
 0x204   : > { %1321 = vrot.lane.b32.xlu1 %v2372_v9, %s2581_s28  ;;  %1289 = vrot.lane.b32.xlu0 %v2356_v57, %s2581_s28 }
 0x206   : > { %v1312_v50 = vpop.permute.xlu1 %1311  ;;  %v1280_v26 = vpop.permute.xlu0 %1279 }
 0x207   : > { %v1709_v2 = vsel %vm1683_vm9, %v1676_v43, %v1312_v50  ;;  %v1693_v51 = vsel %vm1683_vm9, %v1660_v11, %v1280_v26 }
 0x208   : > { %1323 = vrot.lane.b32.xlu1 %v2373_v55, %s2581_s28  ;;  %1291 = vrot.lane.b32.xlu0 %v2357_v21, %s2581_s28 }
 0x20a   : > { %v1438_v44 = vpop.permute.xlu1 %1437  ;;  %v1406_v10 = vpop.permute.xlu0 %1405 }
 0x20b   : > { %v1741_v62 = vsel %vm1716_vm10, %v1708_v40, %v1438_v44  ;;  %v1725_v36 = vsel %vm1716_vm10, %v1692_v25, %v1406_v10 }
 0x20c   : > { %1449 = vrot.lane.b32.xlu1 %v2404_v34, %s2583_s6  ;;  %1417 = vrot.lane.b32.xlu0 %v2388_v27, %s2583_s6 }
 0x20d   : > { %2499 = vmatprep.mubr.msk.f32.mxu0 %vm1760_vm11, %v1725_v36  ;;  %2523 = vmatprep.mubr.msk.f32.mxu1 %vm1760_vm11, %v1741_v62 }
 0x20e   : > { %v932_v22 = vpop.permute.xlu1 %931  ;;  %v900_v29 = vpop.permute.xlu0 %899 }
 0x20f   : > { %v1612_v50 = vsel %vm1584_vm6, %v3412_v45, %v932_v22  ;;  %v1596_v26 = vsel %vm1584_vm6, %v3324_v31, %v900_v29  ;;  %v3923_v22 = vld [vmem:[%s4098_s2] ss:$0 sm:$0xff] }
 0x210   : > { %1451 = vrot.lane.b32.xlu1 %v2405_v33, %s2583_s6  ;;  %1419 = vrot.lane.b32.xlu0 %v2389_v24, %s2583_s6 }
 0x212   : > { %v1058_v1 = vpop.permute.xlu1 %1057  ;;  %v1026_v0 = vpop.permute.xlu0 %1025 }
 0x213   : > { %v1644_v59 = vsel %vm1617_vm7, %v1611_v14, %v1058_v1  ;;  %v1628_v53 = vsel %vm1617_vm7, %v1595_v60, %v1026_v0 }
 0x216   : > { %v1440_v52 = vpop.permute.xlu1 %1439  ;;  %v1408_v54 = vpop.permute.xlu0 %1407 }
 0x217   : > { %v1742_v48 = vsel %vm1716_vm10, %v1709_v2, %v1440_v52  ;;  %v1726_v23 = vsel %vm1716_vm10, %v1693_v51, %v1408_v54 }
 0x218   : > { %2500 = vmatmul.mubr.msk.f32.gmra.mrb[8].mxu0 %vm1760_vm11, %v1726_v23  ;;  %2524 = vmatmul.mubr.msk.f32.gmra.mrb[8].mxu1 %vm1760_vm11, %v1742_v48 }
 0x21a   : > { %v1060_v32 = vpop.permute.xlu1 %1059  ;;  %v1028_v12 = vpop.permute.xlu0 %1027 }
 0x21b   : > { %v1645_v37 = vsel %vm1617_vm7, %v1612_v50, %v1060_v32  ;;  %v1629_v4 = vsel %vm1617_vm7, %v1596_v26, %v1028_v12  ;;  %v4230_v12 = vld [vmem:[#allocation35_spill] sm:$0xff] }
 0x21e   : > { %v1186_v16 = vpop.permute.xlu1 %1185  ;;  %v1154_v3 = vpop.permute.xlu0 %1153 }
 0x21f   : > { %v1677_v58 = vsel %vm1650_vm8, %v1644_v59, %v1186_v16  ;;  %v1661_v13 = vsel %vm1650_vm8, %v1628_v53, %v1154_v3  ;;  %v4231_v3 = vld [vmem:[#allocation38_spill] sm:$0xff] }
 0x222   : > { %v1188_v18 = vpop.permute.xlu1 %1187  ;;  %v1156_v5 = vpop.permute.xlu0 %1155 }
 0x223   : > { %v1678_v63 = vsel %vm1650_vm8, %v1645_v37, %v1188_v18  ;;  %v1662_v49 = vsel %vm1650_vm8, %v1629_v4, %v1156_v5 }
 0x226   : > { %v1314_v39 = vpop.permute.xlu1 %1313  ;;  %v1282_v61 = vpop.permute.xlu0 %1281 }
 0x227   : > { %v1710_v17 = vsel %vm1683_vm9, %v1677_v58, %v1314_v39  ;;  %v1694_v41 = vsel %vm1683_vm9, %v1661_v13, %v1282_v61 }
 0x22a   : > { %v3882_v42 = vpop.permute.xlu1 %933  ;;  %v3884_v7 = vpop.permute.xlu0 %901 }
 0x22b   : > { %v1613_v16 = vsel %vm1584_vm6, %v4230_v12, %v3882_v42  ;;  %v1597_v18 = vsel %vm1584_vm6, %v4231_v3, %v3884_v7 }
 0x22e   : > { %v1316_v28 = vpop.permute.xlu1 %1315  ;;  %v1284_v38 = vpop.permute.xlu0 %1283 }
 0x22f   : > { %v1711_v47 = vsel %vm1683_vm9, %v1678_v63, %v1316_v28  ;;  %v1695_v15 = vsel %vm1683_vm9, %v1662_v49, %v1284_v38 }
 0x232   : > { %v1442_v9 = vpop.permute.xlu1 %1441  ;;  %v1410_v57 = vpop.permute.xlu0 %1409 }
 0x233   : > { %v1743_v30 = vsel %vm1716_vm10, %v1710_v17, %v1442_v9  ;;  %v1727_v6 = vsel %vm1716_vm10, %v1694_v41, %v1410_v57  ;;  %v4232_v41 = vld [vmem:[#allocation41_spill] sm:$0xff] }
 0x234   : > { %2502 = vmatprep.mubr.msk.f32.mxu0 %vm1760_vm11, %v1727_v6  ;;  %2526 = vmatprep.mubr.msk.f32.mxu1 %vm1760_vm11, %v1743_v30  ;;  %v4233_v57 = vld [vmem:[#allocation33_spill] sm:$0xff] }
 0x236   : > { %v3902_v56 = vpop.permute.xlu1 %935  ;;  %v3904_v8 = vpop.permute.xlu0 %903 }
 0x237   : > { %v1614_v9 = vsel %vm1584_vm6, %v4232_v41, %v3902_v56  ;;  %v1598_v30 = vsel %vm1584_vm6, %v4233_v57, %v3904_v8 }
 0x23a   : > { %v1062_v55 = vpop.permute.xlu1 %1061  ;;  %v1030_v21 = vpop.permute.xlu0 %1029 }
 0x23b   : > { %v1646_v5 = vsel %vm1617_vm7, %v1613_v16, %v1062_v55  ;;  %v1630_v39 = vsel %vm1617_vm7, %v1597_v18, %v1030_v21 }
 0x23e   : > { %v1444_v34 = vpop.permute.xlu1 %1443  ;;  %v1412_v27 = vpop.permute.xlu0 %1411 }
 0x23f   : > { %v1744_v45 = vsel %vm1716_vm10, %v1711_v47, %v1444_v34  ;;  %v1728_v40 = vsel %vm1716_vm10, %v1695_v15, %v1412_v27 }
 0x240   : > { %2503 = vmatmul.mubr.msk.f32.gmra.mrb[10].mxu0 %vm1760_vm11, %v1728_v40  ;;  %2527 = vmatmul.mubr.msk.f32.gmra.mrb[10].mxu1 %vm1760_vm11, %v1744_v45 }
 0x242   : > { %v1064_v31 = vpop.permute.xlu1 %1063  ;;  %v1032_v25 = vpop.permute.xlu0 %1031 }
 0x243   : > { %v1647_v6 = vsel %vm1617_vm7, %v1614_v9, %v1064_v31  ;;  %v1631_v55 = vsel %vm1617_vm7, %v1598_v30, %v1032_v25 }
 0x246   : > { %v1190_v44 = vpop.permute.xlu1 %1189  ;;  %v1158_v10 = vpop.permute.xlu0 %1157 }
 0x247   : > { %v1679_v61 = vsel %vm1650_vm8, %v1646_v5, %v1190_v44  ;;  %v1663_v28 = vsel %vm1650_vm8, %v1630_v39, %v1158_v10  ;;  %v4236_v39 = vld [vmem:[#allocation12_spill] sm:$0xff] }
 0x24a   : > { %v1192_v62 = vpop.permute.xlu1 %1191  ;;  %v1160_v36 = vpop.permute.xlu0 %1159 }
 0x24b   : > { %v1680_v21 = vsel %vm1650_vm8, %v1647_v6, %v1192_v62  ;;  %v1664_v50 = vsel %vm1650_vm8, %v1631_v55, %v1160_v36 }
 0x24e   : > { %v1318_v33 = vpop.permute.xlu1 %1317  ;;  %v1286_v24 = vpop.permute.xlu0 %1285 }
 0x24f   : > { %v1712_v38 = vsel %vm1683_vm9, %v1679_v61, %v1318_v33  ;;  %v1696_v14 = vsel %vm1683_vm9, %v1663_v28, %v1286_v24  ;;  %v4237_v61 = vld [vmem:[#allocation13_spill] sm:$0xff] }
 0x250   : > { %v2489_v29 = vpop.f32.mrb[0].mxu0  ;;  %v2513_v1 = vpop.f32.mrb[0].mxu1 }
 0x251   : > { %v1933_v0 = vadd.f32 %v2489_v29, %v3923_v22  ;;  %v2013_v19 = vadd.f32 %v2513_v1, %v3923_v22  ;;  %v1927_v20 = vpop.f32.mrb[1].mxu0  ;;  %v2007_v46 = vpop.f32.mrb[1].mxu1 }
 0x252   : > { %v1928_v35 = vadd.f32 %v3923_v22, %v1927_v20  ;;  %v2008_v43 = vadd.f32 %v3923_v22, %v2007_v46  ;;  %v3935_v11 = vpop.permute.xlu1 %937  ;;  %v3937_v2 = vpop.permute.xlu0 %905 }
 0x253   : > { %v2087_v51 = vmax.f32 %v1933_v0, 0.0  ;;  %v2103_v52 = vmax.f32 %v2013_v19, 0.0 }
 0x254   : > { %v2086_v54 = vmax.f32 %v1928_v35, 0.0  ;;  %v2102_v48 = vmax.f32 %v2008_v43, 0.0  ;;  %v4234_v43 = vld [vmem:[#allocation7_spill] sm:$0xff] }
 0x255   : > { %2120 = vst.msk [vmem:[%s3931_s14 + $0x8] sm:$0xff] %vm2118_vm12, %v2087_v51  ;;  %2136 = vst.msk [vmem:[%s3931_s14 + $0x88] sm:$0xff] %vm2118_vm12, %v2103_v52  ;;  %v1615_v51 = vsel %vm1584_vm6, %v4234_v43, %v3935_v11  ;;  %v4235_v52 = vld [vmem:[#allocation34_spill] sm:$0xff] }
 0x256   : > { %2119 = vst.msk [vmem:[%s3931_s14] sm:$0xff] %vm2118_vm12, %v2086_v54  ;;  %2135 = vst.msk [vmem:[%s3931_s14 + $0x80] sm:$0xff] %vm2118_vm12, %v2102_v48  ;;  %v1320_v23 = vpop.permute.xlu1 %1319  ;;  %v1288_v32 = vpop.permute.xlu0 %1287  ;;  %v1599_v54 = vsel %vm1584_vm6, %v4235_v52, %v3937_v2 }
 0x257   : > { %v1713_v26 = vsel %vm1683_vm9, %v1680_v21, %v1320_v23  ;;  %v1697_v37 = vsel %vm1683_vm9, %v1664_v50, %v1288_v32 }
 0x25a   : > { %v1446_v60 = vpop.permute.xlu1 %1445  ;;  %v1414_v59 = vpop.permute.xlu0 %1413 }
 0x25b   : > { %v1745_v42 = vsel %vm1716_vm10, %v1712_v38, %v1446_v60  ;;  %v1729_v53 = vsel %vm1716_vm10, %v1696_v14, %v1414_v59 }
 0x25c   : > { %2505 = vmatprep.mubr.msk.f32.mxu0 %vm1760_vm11, %v1729_v53  ;;  %2529 = vmatprep.mubr.msk.f32.mxu1 %vm1760_vm11, %v1745_v42 }
 0x25e   : > { %v940_v7 = vpop.permute.xlu1 %939  ;;  %v908_v58 = vpop.permute.xlu0 %907 }
 0x25f   : > { %v1616_v11 = vsel %vm1584_vm6, %v4236_v39, %v940_v7  ;;  %v1600_v2 = vsel %vm1584_vm6, %v4237_v61, %v908_v58 }
 0x262   : > { %v1066_v13 = vpop.permute.xlu1 %1065  ;;  %v1034_v17 = vpop.permute.xlu0 %1033 }
 0x263   : > { %v1648_v48 = vsel %vm1617_vm7, %v1615_v51, %v1066_v13  ;;  %v1632_v23 = vsel %vm1617_vm7, %v1599_v54, %v1034_v17 }
 0x266   : > { %v1448_v4 = vpop.permute.xlu1 %1447  ;;  %v1416_v63 = vpop.permute.xlu0 %1415 }
 0x267   : > { %v1746_v56 = vsel %vm1716_vm10, %v1713_v26, %v1448_v4  ;;  %v1730_v49 = vsel %vm1716_vm10, %v1697_v37, %v1416_v63 }
 0x268   : > { %2506 = vmatmul.mubr.msk.f32.gmra.mrb[12].mxu0 %vm1760_vm11, %v1730_v49  ;;  %2530 = vmatmul.mubr.msk.f32.gmra.mrb[12].mxu1 %vm1760_vm11, %v1746_v56 }
 0x26a   : > { %v1068_v8 = vpop.permute.xlu1 %1067  ;;  %v1036_v47 = vpop.permute.xlu0 %1035 }
 0x26b   : > { %v1649_v14 = vsel %vm1617_vm7, %v1616_v11, %v1068_v8  ;;  %v1633_v60 = vsel %vm1617_vm7, %v1600_v2, %v1036_v47 }
 0x26e   : > { %v1194_v15 = vpop.permute.xlu1 %1193  ;;  %v1162_v34 = vpop.permute.xlu0 %1161 }
 0x26f   : > { %v1681_v32 = vsel %vm1650_vm8, %v1648_v48, %v1194_v15  ;;  %v1665_v12 = vsel %vm1650_vm8, %v1632_v23, %v1162_v34 }
 0x272   : > { %v1196_v27 = vpop.permute.xlu1 %1195  ;;  %v1164_v45 = vpop.permute.xlu0 %1163 }
 0x273   : > { %v1682_v59 = vsel %vm1650_vm8, %v1649_v14, %v1196_v27  ;;  %v1666_v42 = vsel %vm1650_vm8, %v1633_v60, %v1164_v45 }
 0x274   : > { %v2492_v40 = vpop.f32.mrb[2].mxu0  ;;  %v2516_v31 = vpop.f32.mrb[2].mxu1 }
 0x275   : > { %v1943_v25 = vadd.f32 %v2492_v40, %v3923_v22  ;;  %v2023_v44 = vadd.f32 %v2516_v31, %v3923_v22  ;;  %v1937_v10 = vpop.f32.mrb[3].mxu0  ;;  %v2017_v62 = vpop.f32.mrb[3].mxu1 }
 0x276   : > { %v1938_v36 = vadd.f32 %v3923_v22, %v1937_v10  ;;  %v2018_v33 = vadd.f32 %v3923_v22, %v2017_v62  ;;  %v1322_v24 = vpop.permute.xlu1 %1321  ;;  %v1290_v29 = vpop.permute.xlu0 %1289 }
 0x277   : > { %v2089_v1 = vmax.f32 %v1943_v25, 0.0  ;;  %v2105_v0 = vmax.f32 %v2023_v44, 0.0  ;;  %v1714_v16 = vsel %vm1683_vm9, %v1681_v32, %v1322_v24  ;;  %v1698_v3 = vsel %vm1683_vm9, %v1665_v12, %v1290_v29 }
 0x278   : > { %v2088_v19 = vmax.f32 %v1938_v36, 0.0  ;;  %v2104_v20 = vmax.f32 %v2018_v33, 0.0 }
 0x279   : > { %2122 = vst.msk [vmem:[%s3931_s14 + $0x18] sm:$0xff] %vm2118_vm12, %v2089_v1  ;;  %2138 = vst.msk [vmem:[%s3931_s14 + $0x98] sm:$0xff] %vm2118_vm12, %v2105_v0 }
 0x27a   : > { %2121 = vst.msk [vmem:[%s3931_s14 + $0x10] sm:$0xff] %vm2118_vm12, %v2088_v19  ;;  %2137 = vst.msk [vmem:[%s3931_s14 + $0x90] sm:$0xff] %vm2118_vm12, %v2104_v20  ;;  %v1324_v46 = vpop.permute.xlu1 %1323  ;;  %v1292_v35 = vpop.permute.xlu0 %1291 }
 0x27b   : > { %v1715_v53 = vsel %vm1683_vm9, %v1682_v59, %v1324_v46  ;;  %v1699_v7 = vsel %vm1683_vm9, %v1666_v42, %v1292_v35 }
 0x27e   : > { %v1450_v18 = vpop.permute.xlu1 %1449  ;;  %v1418_v5 = vpop.permute.xlu0 %1417 }
 0x27f   : > { %v1747_v28 = vsel %vm1716_vm10, %v1714_v16, %v1450_v18  ;;  %v1731_v38 = vsel %vm1716_vm10, %v1698_v3, %v1418_v5 }
 0x280   : > { %2508 = vmatprep.mubr.msk.f32.mxu0 %vm1760_vm11, %v1731_v38  ;;  %2532 = vmatprep.mubr.msk.f32.mxu1 %vm1760_vm11, %v1747_v28 }
 0x282   : > { %v1452_v58 = vpop.permute.xlu1 %1451  ;;  %v1420_v13 = vpop.permute.xlu0 %1419 }
 0x283   : > { %v1748_v17 = vsel %vm1716_vm10, %v1715_v53, %v1452_v58  ;;  %v1732_v41 = vsel %vm1716_vm10, %v1699_v7, %v1420_v13 }
 0x284   : > { %2509 = vmatmul.mubr.msk.f32.gmra.mrb[14].mxu0 %vm1760_vm11, %v1732_v41  ;;  %2533 = vmatmul.mubr.msk.f32.gmra.mrb[14].mxu1 %vm1760_vm11, %v1748_v17 }
 0x29c   : > { %v2495_v9 = vpop.f32.mrb[4].mxu0  ;;  %v2519_v57 = vpop.f32.mrb[4].mxu1 }
 0x29d   : > { %v1953_v30 = vadd.f32 %v2495_v9, %v3923_v22  ;;  %v2033_v6 = vadd.f32 %v2519_v57, %v3923_v22  ;;  %v1947_v55 = vpop.f32.mrb[5].mxu0  ;;  %v2027_v21 = vpop.f32.mrb[5].mxu1 }
 0x29e   : > { %v1948_v50 = vadd.f32 %v3923_v22, %v1947_v55  ;;  %v2028_v26 = vadd.f32 %v3923_v22, %v2027_v21 }
 0x29f   : > { %v2091_v37 = vmax.f32 %v1953_v30, 0.0  ;;  %v2107_v4 = vmax.f32 %v2033_v6, 0.0 }
 0x2a0   : > { %v2090_v63 = vmax.f32 %v1948_v50, 0.0  ;;  %v2106_v56 = vmax.f32 %v2028_v26, 0.0 }
 0x2a1   : > { %2124 = vst.msk [vmem:[%s3931_s14 + $0x28] sm:$0xff] %vm2118_vm12, %v2091_v37  ;;  %2140 = vst.msk [vmem:[%s3931_s14 + $0xa8] sm:$0xff] %vm2118_vm12, %v2107_v4 }
 0x2a2   : > { %2123 = vst.msk [vmem:[%s3931_s14 + $0x20] sm:$0xff] %vm2118_vm12, %v2090_v63  ;;  %2139 = vst.msk [vmem:[%s3931_s14 + $0xa0] sm:$0xff] %vm2118_vm12, %v2106_v56 }
 0x2c4   : > { %v2498_v49 = vpop.f32.mrb[6].mxu0  ;;  %v2522_v8 = vpop.f32.mrb[6].mxu1 }
 0x2c5   : > { %v1963_v47 = vadd.f32 %v2498_v49, %v3923_v22  ;;  %v2043_v15 = vadd.f32 %v2522_v8, %v3923_v22  ;;  %v1957_v34 = vpop.f32.mrb[7].mxu0  ;;  %v2037_v27 = vpop.f32.mrb[7].mxu1 }
 0x2c6   : > { %v1958_v45 = vadd.f32 %v3923_v22, %v1957_v34  ;;  %v2038_v40 = vadd.f32 %v3923_v22, %v2037_v27 }
 0x2c7   : > { %v2093_v31 = vmax.f32 %v1963_v47, 0.0  ;;  %v2109_v25 = vmax.f32 %v2043_v15, 0.0 }
 0x2c8   : > { %v2092_v44 = vmax.f32 %v1958_v45, 0.0  ;;  %v2108_v10 = vmax.f32 %v2038_v40, 0.0 }
 0x2c9   : > { %2126 = vst.msk [vmem:[%s3931_s14 + $0x38] sm:$0xff] %vm2118_vm12, %v2093_v31  ;;  %2142 = vst.msk [vmem:[%s3931_s14 + $0xb8] sm:$0xff] %vm2118_vm12, %v2109_v25 }
 0x2ca   : > { %2125 = vst.msk [vmem:[%s3931_s14 + $0x30] sm:$0xff] %vm2118_vm12, %v2092_v44  ;;  %2141 = vst.msk [vmem:[%s3931_s14 + $0xb0] sm:$0xff] %vm2118_vm12, %v2108_v10 }
 0x2eb   : > { %v2501_v62 = vpop.f32.mrb[8].mxu0  ;;  %v2525_v36 = vpop.f32.mrb[8].mxu1 }
 0x2ec   : > { %v1973_v33 = vadd.f32 %v2501_v62, %v3923_v22  ;;  %v2053_v24 = vadd.f32 %v2525_v36, %v3923_v22  ;;  %v1967_v29 = vpop.f32.mrb[9].mxu0  ;;  %v2047_v1 = vpop.f32.mrb[9].mxu1 }
 0x2ed   : > { %v1968_v0 = vadd.f32 %v3923_v22, %v1967_v29  ;;  %v2048_v19 = vadd.f32 %v3923_v22, %v2047_v1 }
 0x2ee   : > { %v2095_v20 = vmax.f32 %v1973_v33, 0.0  ;;  %v2111_v46 = vmax.f32 %v2053_v24, 0.0 }
 0x2ef   : > { %v2094_v35 = vmax.f32 %v1968_v0, 0.0  ;;  %v2110_v43 = vmax.f32 %v2048_v19, 0.0 }
 0x2f0   : > { %2128 = vst.msk [vmem:[%s3931_s14 + $0x48] sm:$0xff] %vm2118_vm12, %v2095_v20  ;;  %2144 = vst.msk [vmem:[%s3931_s14 + $0xc8] sm:$0xff] %vm2118_vm12, %v2111_v46 }
 0x2f1   : > { %2127 = vst.msk [vmem:[%s3931_s14 + $0x40] sm:$0xff] %vm2118_vm12, %v2094_v35  ;;  %2143 = vst.msk [vmem:[%s3931_s14 + $0xc0] sm:$0xff] %vm2118_vm12, %v2110_v43 }
 0x313   : > { %v2504_v51 = vpop.f32.mrb[10].mxu0  ;;  %v2528_v52 = vpop.f32.mrb[10].mxu1 }
 0x314   : > { %v1983_v54 = vadd.f32 %v2504_v51, %v3923_v22  ;;  %v2063_v48 = vadd.f32 %v2528_v52, %v3923_v22  ;;  %v1977_v23 = vpop.f32.mrb[11].mxu0  ;;  %v2057_v32 = vpop.f32.mrb[11].mxu1 }
 0x315   : > { %v1978_v12 = vadd.f32 %v3923_v22, %v1977_v23  ;;  %v2058_v16 = vadd.f32 %v3923_v22, %v2057_v32 }
 0x316   : > { %v2097_v3 = vmax.f32 %v1983_v54, 0.0  ;;  %v2113_v18 = vmax.f32 %v2063_v48, 0.0 }
 0x317   : > { %v2096_v5 = vmax.f32 %v1978_v12, 0.0  ;;  %v2112_v39 = vmax.f32 %v2058_v16, 0.0 }
 0x318   : > { %2130 = vst.msk [vmem:[%s3931_s14 + $0x58] sm:$0xff] %vm2118_vm12, %v2097_v3  ;;  %2146 = vst.msk [vmem:[%s3931_s14 + $0xd8] sm:$0xff] %vm2118_vm12, %v2113_v18 }
 0x319   : > { %2129 = vst.msk [vmem:[%s3931_s14 + $0x50] sm:$0xff] %vm2118_vm12, %v2096_v5  ;;  %2145 = vst.msk [vmem:[%s3931_s14 + $0xd0] sm:$0xff] %vm2118_vm12, %v2112_v39 }
 0x33b   : > { %v2507_v11 = vpop.f32.mrb[12].mxu0  ;;  %v2531_v61 = vpop.f32.mrb[12].mxu1 }
 0x33c   : > { %v1993_v2 = vadd.f32 %v2507_v11, %v3923_v22  ;;  %v2073_v28 = vadd.f32 %v2531_v61, %v3923_v22  ;;  %v1987_v38 = vpop.f32.mrb[13].mxu0  ;;  %v2067_v14 = vpop.f32.mrb[13].mxu1 }
 0x33d   : > { %v1988_v60 = vadd.f32 %v3923_v22, %v1987_v38  ;;  %v2068_v59 = vadd.f32 %v3923_v22, %v2067_v14 }
 0x33e   : > { %v2099_v42 = vmax.f32 %v1993_v2, 0.0  ;;  %v2115_v53 = vmax.f32 %v2073_v28, 0.0 }
 0x33f   : > { %v2098_v7 = vmax.f32 %v1988_v60, 0.0  ;;  %v2114_v58 = vmax.f32 %v2068_v59, 0.0 }
 0x340   : > { %2132 = vst.msk [vmem:[%s3931_s14 + $0x68] sm:$0xff] %vm2118_vm12, %v2099_v42  ;;  %2148 = vst.msk [vmem:[%s3931_s14 + $0xe8] sm:$0xff] %vm2118_vm12, %v2115_v53 }
 0x341   : > { %2131 = vst.msk [vmem:[%s3931_s14 + $0x60] sm:$0xff] %vm2118_vm12, %v2098_v7  ;;  %2147 = vst.msk [vmem:[%s3931_s14 + $0xe0] sm:$0xff] %vm2118_vm12, %v2114_v58 }
 0x357   : > { %v2510_v13 = vpop.f32.mrb[14].mxu0  ;;  %v2534_v17 = vpop.f32.mrb[14].mxu1 }
 0x358   : > { %v2003_v41 = vadd.f32 %v2510_v13, %v3923_v22  ;;  %v2083_v9 = vadd.f32 %v2534_v17, %v3923_v22  ;;  %v1997_v57 = vpop.f32.mrb[15].mxu0  ;;  %v2077_v30 = vpop.f32.mrb[15].mxu1 }
 0x359   : > { %v1998_v6 = vadd.f32 %v3923_v22, %v1997_v57  ;;  %v2078_v55 = vadd.f32 %v3923_v22, %v2077_v30 }
 0x35a   : > { %v2101_v21 = vmax.f32 %v2003_v41, 0.0  ;;  %v2117_v50 = vmax.f32 %v2083_v9, 0.0 }
 0x35b   : > { %v2100_v26 = vmax.f32 %v1998_v6, 0.0  ;;  %v2116_v37 = vmax.f32 %v2078_v55, 0.0 }
 0x35c   : > { %2134 = vst.msk [vmem:[%s3931_s14 + $0x78] sm:$0xff] %vm2118_vm12, %v2101_v21  ;;  %2150 = vst.msk [vmem:[%s3931_s14 + $0xf8] sm:$0xff] %vm2118_vm12, %v2117_v50 }
 0x35d   : > { %2133 = vst.msk [vmem:[%s3931_s14 + $0x70] sm:$0xff] %vm2118_vm12, %v2100_v26  ;;  %2149 = vst.msk [vmem:[%s3931_s14 + $0xf0] sm:$0xff] %vm2118_vm12, %v2116_v37 }
 0x35e PF: > { %s13_s12 = sadd.s32 1, %s2573_s12  }
 0x35f   : > { %p10_p4 = scmp.ge.s32.totalorder %s13_s12, 4  }
 0x361   :  { %12 = sbr.rel (!%p10_p4) target bundleno = 1 (0x1), region = 64 }

</bundles_post_ra>
